<compile_context>
chip_gen: v7x
topology: tpu7x:2x2x1
jax: 0.10.0
libtpu: 0.0.40
codegen_flags: <defaults>
</compile_context>

<pallas_src>
import jax
import jax.numpy as jnp
from jax.experimental import pallas as pl
from jax.experimental.pallas import tpu as pltpu

_HIDDEN = 1500
_NEG_SLOPE = 0.01  # PyTorch LeakyReLU default


def _round_up(n, m):
    return ((n + m - 1) // m) * m


def _latent_dis_kernel(x_ref, w1_ref, w2_ref, b2_ref, o_ref):
    # x_ref : (Kp, TB)  -- x^T with a ones row (bias fold), zero-padded rows
    # w1_ref: (Hp, Kp)  -- W1 with b1 as an extra column, zero-padded
    # w2_ref: (1, Hp)   -- second Linear weights as a row vector
    # b2_ref: (1, 1)    -- scalar in SMEM
    # o_ref : (1, TB)   -- lane-dense output row (batch on lanes)
    # First Linear + folded bias on the MXU: (Hp, Kp) @ (Kp, TB) -> (Hp, TB).
    h = jnp.dot(w1_ref[...], x_ref[...], preferred_element_type=jnp.float32)

    # LeakyReLU(0.01): single VPU mul + max (slope < 1 so max(h, a*h) == leaky).
    h = jnp.maximum(h, _NEG_SLOPE * h)

    # Second Linear on the MXU as well: (1, Hp) @ (Hp, TB) -> (1, TB).
    # Zero-padded hidden rows/columns contribute exactly 0.
    z = jnp.dot(w2_ref[...], h, preferred_element_type=jnp.float32) + b2_ref[0, 0]

    # Exact sigmoid on the lane-dense (1, TB) row (only ~TB/128 vregs).
    o_ref[...] = (1.0 / (1.0 + jnp.exp(-z))).astype(o_ref.dtype)


def latent_dis_forward(x, w1, b1, w2, b2, *, tb_max=1024):
    """Forward pass of Latent_Dis.

    x:  (B, L) f32
    w1: (H, L) f32   -- PyTorch Linear(L, H).weight
    b1: (H,)   f32   -- PyTorch Linear(L, H).bias
    w2: (1, H) f32   -- PyTorch Linear(H, 1).weight
    b2: (1,)   f32   -- PyTorch Linear(H, 1).bias
    returns (B, 1) f32
    """
    B, L = x.shape
    H = w1.shape[0]

    K = L + 1                      # +1 column/row for the folded bias
    Kp = _round_up(K, 8)           # sublane-friendly contraction dim
    Hp = _round_up(H, 128)         # lane-friendly hidden dim (1500 -> 1536)

    # Fold b1 into w1 and zero-pad to (Hp, Kp).
    w1_aug = jnp.concatenate([w1, b1[:, None]], axis=1)      # (H, K)
    w1_aug = jnp.pad(w1_aug, ((0, Hp - H), (0, Kp - K)))      # (Hp, Kp)
    w2_p = jnp.pad(w2, ((0, 0), (0, Hp - H)))                 # (1, Hp)
    b2_s = jnp.reshape(b2, (1, 1)).astype(jnp.float32)        # SMEM scalar

    # Batch tile: TB lanes per grid step (<= tb_max, multiple of 8; full batch
    # when small). Bounds the (Hp, TB) f32 hidden slab (~6 MiB at TB=1024).
    TB = min(tb_max, _round_up(B, 8))
    Bp = _round_up(B, TB)

    # x^T with a ones row appended (bias fold), zero-padded to (Kp, Bp).
    x_t = jnp.concatenate([x.T, jnp.ones((1, B), x.dtype)], axis=0)  # (K, B)
    x_t = jnp.pad(x_t, ((0, Kp - K), (0, Bp - B)))                   # (Kp, Bp)

    out = pl.pallas_call(
        _latent_dis_kernel,
        out_shape=jax.ShapeDtypeStruct((1, Bp), jnp.float32),
        grid=(Bp // TB,),
        in_specs=[
            pl.BlockSpec((Kp, TB), lambda i: (0, i)),   # x^T: streamed over batch
            pl.BlockSpec((Hp, Kp), lambda i: (0, 0)),   # w1 (+b1): VMEM-resident
            pl.BlockSpec((1, Hp), lambda i: (0, 0)),    # w2 row: VMEM-resident
            pl.BlockSpec((1, 1), lambda i: (0, 0),
                         memory_space=pltpu.MemorySpace.SMEM),  # b2 scalar
        ],
        out_specs=pl.BlockSpec((1, TB), lambda i: (0, i)),  # lane-dense output
        compiler_params=pltpu.CompilerParams(
            dimension_semantics=("parallel",),  # shard batch tiles across TCs
            vmem_limit_bytes=48 * 1024 * 1024,  # ample, with headroom on v7x
        ),
    )(x_t, w1_aug, w2_p, b2_s)

    return out[0, :B].reshape(B, 1)


def init_latent_dis_params(latent_size, hidden=_HIDDEN, seed=0):
    """Deterministic init mimicking PyTorch nn.Linear default U(-1/sqrt(fan_in), 1/sqrt(fan_in))."""
    k1, k2, k3, k4 = jax.random.split(jax.random.PRNGKey(seed), 4)
    bound1 = 1.0 / (latent_size ** 0.5)
    bound2 = 1.0 / (hidden ** 0.5)
    w1 = jax.random.uniform(k1, (hidden, latent_size), jnp.float32, -bound1, bound1)
    b1 = jax.random.uniform(k2, (hidden,), jnp.float32, -bound1, bound1)
    w2 = jax.random.uniform(k3, (1, hidden), jnp.float32, -bound2, bound2)
    b2 = jax.random.uniform(k4, (1,), jnp.float32, -bound2, bound2)
    return w1, b1, w2, b2


def latent_dis_reference(x, w1, b1, w2, b2):
    """Pure-JAX reference for correctness checking (PyTorch-layout weights)."""
    h = jnp.dot(x, w1.T, precision=jax.lax.Precision.HIGHEST) + b1
    h = jnp.where(h > 0, h, _NEG_SLOPE * h)
    z = jnp.dot(h, w2.T, precision=jax.lax.Precision.HIGHEST) + b2
    return jax.nn.sigmoid(z)


if __name__ == "__main__":
    batch = 2
    latent_size = 32

    key = jax.random.PRNGKey(0)
    x = jax.random.normal(key, (batch, latent_size), jnp.float32)

    w1, b1, w2, b2 = init_latent_dis_params(latent_size, hidden=_HIDDEN, seed=0)

    out = jax.block_until_ready(latent_dis_forward(x, w1, b1, w2, b2))

    ref = latent_dis_reference(x, w1, b1, w2, b2)
    assert out.shape == (batch, 1), out.shape
    assert jnp.allclose(out, ref, atol=2e-3, rtol=2e-3), (out, ref)

    print("KERNEL_OK")
</pallas_src>

<mosaic_0001>
module attributes {stable_mosaic.version = 11 : i64} {
  func.func @_latent_dis_kernel(%arg0: i32, %arg1: memref<40x8xf32, #tpu.memory_space<vmem>>, %arg2: memref<1536x40xf32, #tpu.memory_space<vmem>>, %arg3: memref<1x1536xf32, #tpu.memory_space<vmem>>, %arg4: memref<1x1xf32, #tpu.memory_space<smem>>, %arg5: memref<1x8xf32, #tpu.memory_space<vmem>>) attributes {dimension_semantics = [#tpu.dimension_semantics<parallel>], iteration_bounds = array<i64: 1>, scalar_prefetch = 0 : i64, scratch_operands = 0 : i64, tpu.core_type = #tpu.core_type<tc>, window_params = [{transform_indices = @transform_0, window_bounds = array<i64: 40, 8>}, {pipeline_mode = #tpu.pipeline_mode<synchronous>, transform_indices = @transform_1, window_bounds = array<i64: 1536, 40>}, {pipeline_mode = #tpu.pipeline_mode<synchronous>, transform_indices = @transform_2, window_bounds = array<i64: 1, 1536>}, {transform_indices = @transform_3, window_bounds = array<i64: 1, 1>}, {transform_indices = @transform_4, window_bounds = array<i64: 1, 8>}]} {
    %c0 = arith.constant 0 : index
    %c0_0 = arith.constant 0 : index
    %0 = vector.load %arg2[%c0, %c0_0] : memref<1536x40xf32, #tpu.memory_space<vmem>>, vector<1536x40xf32>
    %c0_1 = arith.constant 0 : index
    %c0_2 = arith.constant 0 : index
    %1 = vector.load %arg1[%c0_1, %c0_2] : memref<40x8xf32, #tpu.memory_space<vmem>>, vector<40x8xf32>
    %cst = arith.constant dense<0.000000e+00> : vector<1536x8xf32>
    %2 = tpu.matmul %0, %1, %cst {dimension_numbers = #tpu.dot_dimension_numbers<[1], [0], [0], [1], [0, 0, 1, 1], [], []>} : vector<1536x40xf32>, vector<40x8xf32>, vector<1536x8xf32> -> vector<1536x8xf32>
    %cst_3 = arith.constant 0.00999999977 : f32
    %3 = vector.broadcast %cst_3 : f32 to vector<1536x8xf32>
    %4 = arith.mulf %3, %2 : vector<1536x8xf32>
    %5 = arith.maximumf %2, %4 : vector<1536x8xf32>
    %c0_4 = arith.constant 0 : index
    %c0_5 = arith.constant 0 : index
    %6 = vector.load %arg3[%c0_4, %c0_5] : memref<1x1536xf32, #tpu.memory_space<vmem>>, vector<1x1536xf32>
    %cst_6 = arith.constant dense<0.000000e+00> : vector<1x8xf32>
    %7 = tpu.matmul %6, %5, %cst_6 {dimension_numbers = #tpu.dot_dimension_numbers<[1], [0], [0], [1], [0, 0, 1, 1], [], []>} : vector<1x1536xf32>, vector<1536x8xf32>, vector<1x8xf32> -> vector<1x8xf32>
    %c0_7 = arith.constant 0 : index
    %c0_8 = arith.constant 0 : index
    %8 = memref.load %arg4[%c0_7, %c0_8] : memref<1x1xf32, #tpu.memory_space<smem>>
    %9 = vector.broadcast %8 : f32 to vector<1x8xf32>
    %10 = arith.addf %7, %9 : vector<1x8xf32>
    %cst_9 = arith.constant 0.000000e+00 : f32
    %11 = vector.broadcast %cst_9 : f32 to vector<1x8xf32>
    %12 = arith.subf %11, %10 : vector<1x8xf32>
    %13 = math.exp %12 : vector<1x8xf32>
    %cst_10 = arith.constant 1.000000e+00 : f32
    %14 = vector.broadcast %cst_10 : f32 to vector<1x8xf32>
    %15 = arith.addf %14, %13 : vector<1x8xf32>
    %cst_11 = arith.constant 1.000000e+00 : f32
    %16 = vector.broadcast %cst_11 : f32 to vector<1x8xf32>
    %17 = arith.divf %16, %15 : vector<1x8xf32>
    %c0_12 = arith.constant 0 : index
    %c0_13 = arith.constant 0 : index
    %18 = vector.load %arg5[%c0_12, %c0_13] : memref<1x8xf32, #tpu.memory_space<vmem>>, vector<1x8xf32>
    tpu.vector_store %arg5[%c0_12, %c0_13], %17 {strides = array<i32>} : memref<1x8xf32, #tpu.memory_space<vmem>>, vector<1x8xf32>,
    return
  }
  func.func @transform_0(%arg0: i32) -> (i32, i32) {
    %c0_i32 = arith.constant 0 : i32
    %c0_i32_0 = arith.constant 0 : i32
    return %c0_i32, %arg0 : i32, i32
  }
  func.func @transform_1(%arg0: i32) -> (i32, i32) {
    %c0_i32 = arith.constant 0 : i32
    %c0_i32_0 = arith.constant 0 : i32
    %c0_i32_1 = arith.constant 0 : i32
    return %c0_i32, %c0_i32_0 : i32, i32
  }
  func.func @transform_2(%arg0: i32) -> (i32, i32) {
    %c0_i32 = arith.constant 0 : i32
    %c0_i32_0 = arith.constant 0 : i32
    %c0_i32_1 = arith.constant 0 : i32
    return %c0_i32, %c0_i32_0 : i32, i32
  }
  func.func @transform_3(%arg0: i32) -> (i32, i32) {
    %c0_i32 = arith.constant 0 : i32
    %c0_i32_0 = arith.constant 0 : i32
    %c0_i32_1 = arith.constant 0 : i32
    return %c0_i32, %c0_i32_0 : i32, i32
  }
  func.func @transform_4(%arg0: i32) -> (i32, i32) {
    %c0_i32 = arith.constant 0 : i32
    %c0_i32_0 = arith.constant 0 : i32
    return %c0_i32, %arg0 : i32, i32
  }
}

</mosaic_0001>

<bundles_post_ra>
// kernel: tpu_custom_call.1
= control target key start
LH: loop header
LB: loop body
LE: loop exit
PB: predicated region body
PF: predicated region fallthrough
CT: control target
= control target key end

     0   :  { %vm216_vm0 = vcmask 326656   ;;  %s4897_s0 = inlined_call_operand.vmem [shape: f32[40,8], index: 0, kind: input, shape index: {}]   ;;  %s4898_s1 = inlined_call_operand.vmem [shape: f32[1536,40], index: 1, kind: input, shape index: {}]   ;;  %s4899_s2 = inlined_call_operand.vmem [shape: f32[1,1536], index: 2, kind: input, shape index: {}]   ;;  %s4900_s3 = inlined_call_operand.<no memory space> [shape: f32[1,1], index: 3, kind: input, shape index: {}]   ;;  %s4901_s4 = inlined_call_operand.hbm [shape: f32[1,8], index: 4, kind: output, shape index: {}]  }
   0x1   :  { %v211_v0 = vld [vmem:[%s4897_s0] sm:$0xff]  ;;  %v212_v1 = vld [vmem:[%s4897_s0 + $0x8] sm:$0xff]  ;;  %v213_v2 = vld [vmem:[%s4897_s0 + $0x10] sm:$0xff] }
   0x2   :  { %v3607_v3 = vpack.c.bf16 %v212_v1, %v211_v0  ;;  %v214_v4 = vld [vmem:[%s4897_s0 + $0x18] sm:$0xff]  ;;  %v19_v5 = vld [vmem:[%s4898_s1] sm:$0xff]  ;;  %v20_v8 = vld [vmem:[%s4898_s1 + $0x8] sm:$0xff] }
   0x3   :  { %v3611_v6 = vpack.c.bf16 %v214_v4, %v213_v2  ;;  %3319 = vmatprep.mubr.msk.f32.mxu0 %vm216_vm0, %v19_v5  ;;  %v215_v7 = vld [vmem:[%s4897_s0 + $0x20] sm:$0xff]  ;;  %v21_v9 = vld [vmem:[%s4898_s1 + $0x10] sm:$0xff]  ;;  %v22_v10 = vld [vmem:[%s4898_s1 + $0x18] sm:$0xff] }
   0x4   :  { %3608 = vmatprep.subr.bf16.mxu0 %v3607_v3  ;;  %3807 = vmatprep.subr.bf16.mxu1 %v3607_v3  ;;  %v23_v11 = vld [vmem:[%s4898_s1 + $0x20] sm:$0xff]  ;;  %v24_v12 = vld [vmem:[%s4898_s1 + $0x28] sm:$0xff]  ;;  %v25_v13 = vld [vmem:[%s4898_s1 + $0x30] sm:$0xff] }
   0x5   :  { %3610 = vmatpush3.bf16.msra.mxu0 %v3607_v3  ;;  %3810 = vmatpush3.bf16.msra.mxu1 %v3607_v3  ;;  %v26_v14 = vld [vmem:[%s4898_s1 + $0x38] sm:$0xff]  ;;  %v27_v15 = vld [vmem:[%s4898_s1 + $0x40] sm:$0xff]  ;;  %v28_v16 = vld [vmem:[%s4898_s1 + $0x48] sm:$0xff] }
   0x6   :  { %3612 = vmatprep.subr.bf16.mxu0 %v3611_v6  ;;  %3808 = vmatprep.subr.bf16.mxu1 %v3611_v6 }
   0x9   :  { %3614 = vmatpush3.bf16.msra.mxu0 %v3611_v6  ;;  %3811 = vmatpush3.bf16.msra.mxu1 %v3611_v6 }
   0xa   :  { %3317 = vmatprep.subr.mxu0 %v215_v7  ;;  %3809 = vmatprep.subr.mxu1 %v215_v7 }
   0xd   :  { %3318 = vmatpush3.msra.mxu0 %v215_v7  ;;  %3812 = vmatpush3.msra.mxu1 %v215_v7 }
   0xe   :  { %3320 = vmatmul.mubr.msk.f32.vlgmr.msra.gmra.mrb[0].mxu0 %vm216_vm0, %v20_v8 }
   0xf   :  { %3322 = vmatprep.mubr.msk.f32.mxu0 %vm216_vm0, %v21_v9 }
  0x12   :  { %3323 = vmatmul.mubr.msk.f32.gmra.mrb[2].mxu0 %vm216_vm0, %v22_v10 }
  0x13   :  { %3325 = vmatprep.mubr.msk.f32.mxu0 %vm216_vm0, %v23_v11 }
  0x16   :  { %3326 = vmatmul.mubr.msk.f32.gmra.mrb[4].mxu0 %vm216_vm0, %v24_v12 }
  0x17   :  { %3328 = vmatprep.mubr.msk.f32.mxu0 %vm216_vm0, %v25_v13 }
  0x1a   :  { %3329 = vmatmul.mubr.msk.f32.gmra.mrb[6].mxu0 %vm216_vm0, %v26_v14 }
  0x1b   :  { %3331 = vmatprep.mubr.msk.f32.mxu0 %vm216_vm0, %v27_v15 }
  0x1c   :  { %10 = vsyncpa [#allocation4], 0  ;;  %v29_v17 = vld [vmem:[%s4898_s1 + $0x50] sm:$0xff]  ;;  %v30_v18 = vld [vmem:[%s4898_s1 + $0x58] sm:$0xff]  ;;  %vm2694_vm1 = vcmask 57344  }
  0x1d   :  { %v31_v19 = vld [vmem:[%s4898_s1 + $0x60] sm:$0xff]  ;;  %v32_v20 = vld [vmem:[%s4898_s1 + $0x68] sm:$0xff]  ;;  %v33_v21 = vld [vmem:[%s4898_s1 + $0x70] sm:$0xff] }
  0x1e   :  { %3332 = vmatmul.mubr.msk.f32.gmra.mrb[8].mxu0 %vm216_vm0, %v28_v16  ;;  %v34_v22 = vld [vmem:[%s4898_s1 + $0x78] sm:$0xff]  ;;  %v35_v23 = vld [vmem:[%s4898_s1 + $0x80] sm:$0xff]  ;;  %v36_v24 = vld [vmem:[%s4898_s1 + $0x88] sm:$0xff] }
  0x1f   :  { %3334 = vmatprep.mubr.msk.f32.mxu0 %vm216_vm0, %v29_v17  ;;  %v37_v25 = vld [vmem:[%s4898_s1 + $0x90] sm:$0xff]  ;;  %v38_v26 = vld [vmem:[%s4898_s1 + $0x98] sm:$0xff]  ;;  %v39_v27 = vld [vmem:[%s4898_s1 + $0xa0] sm:$0xff] }
  0x20   :  { %v40_v28 = vld [vmem:[%s4898_s1 + $0xa8] sm:$0xff]  ;;  %v41_v29 = vld [vmem:[%s4898_s1 + $0xb0] sm:$0xff]  ;;  %v42_v30 = vld [vmem:[%s4898_s1 + $0xb8] sm:$0xff] }
  0x21   :  { %v43_v31 = vld [vmem:[%s4898_s1 + $0xc0] sm:$0xff]  ;;  %v44_v32 = vld [vmem:[%s4898_s1 + $0xc8] sm:$0xff]  ;;  %v45_v33 = vld [vmem:[%s4898_s1 + $0xd0] sm:$0xff] }
  0x22   :  { %3335 = vmatmul.mubr.msk.f32.gmra.mrb[10].mxu0 %vm216_vm0, %v30_v18  ;;  %v46_v34 = vld [vmem:[%s4898_s1 + $0xd8] sm:$0xff]  ;;  %v47_v35 = vld [vmem:[%s4898_s1 + $0xe0] sm:$0xff]  ;;  %v48_v36 = vld [vmem:[%s4898_s1 + $0xe8] sm:$0xff] }
  0x23   :  { %3337 = vmatprep.mubr.msk.f32.mxu0 %vm216_vm0, %v31_v19  ;;  %v49_v37 = vld [vmem:[%s4898_s1 + $0xf0] sm:$0xff]  ;;  %v50_v38 = vld [vmem:[%s4898_s1 + $0xf8] sm:$0xff]  ;;  %v51_v39 = vld [vmem:[%s4898_s1 + $0x100] sm:$0xff] }
  0x24   :  { %v52_v40 = vld [vmem:[%s4898_s1 + $0x108] sm:$0xff]  ;;  %v53_v41 = vld [vmem:[%s4898_s1 + $0x110] sm:$0xff]  ;;  %v54_v42 = vld [vmem:[%s4898_s1 + $0x118] sm:$0xff] }
  0x25   :  { %v55_v43 = vld [vmem:[%s4898_s1 + $0x120] sm:$0xff]  ;;  %v56_v44 = vld [vmem:[%s4898_s1 + $0x128] sm:$0xff]  ;;  %v57_v45 = vld [vmem:[%s4898_s1 + $0x130] sm:$0xff] }
  0x26   :  { %3338 = vmatmul.mubr.msk.f32.gmra.mrb[12].mxu0 %vm216_vm0, %v32_v20  ;;  %v58_v46 = vld [vmem:[%s4898_s1 + $0x138] sm:$0xff]  ;;  %v59_v47 = vld [vmem:[%s4898_s1 + $0x140] sm:$0xff]  ;;  %v60_v48 = vld [vmem:[%s4898_s1 + $0x148] sm:$0xff] }
  0x27   :  { %3340 = vmatprep.mubr.msk.f32.mxu0 %vm216_vm0, %v33_v21  ;;  %v157_v49 = vld [vmem:[%s4898_s1 + $0x450] sm:$0xff]  ;;  %v158_v51 = vld [vmem:[%s4898_s1 + $0x458] sm:$0xff]  ;;  %v63_v53 = vld [vmem:[%s4898_s1 + $0x160] sm:$0xff] }
  0x28   :  { %v61_v50 = vld [vmem:[%s4898_s1 + $0x150] sm:$0xff]  ;;  %3526 = vmatprep.mubr.msk.f32.mxu1 %vm216_vm0, %v157_v49  ;;  %v62_v52 = vld [vmem:[%s4898_s1 + $0x158] sm:$0xff]  ;;  %v159_v54 = vld [vmem:[%s4898_s1 + $0x460] sm:$0xff] }
  0x29   :  { %3527 = vmatmul.mubr.msk.f32.vlgmr.msra.gmra.mrb[0].mxu1 %vm216_vm0, %v158_v51  ;;  %v160_v55 = vld [vmem:[%s4898_s1 + $0x468] sm:$0xff]  ;;  %v65_v57 = vld [vmem:[%s4898_s1 + $0x170] sm:$0xff]  ;;  %v162_v59 = vld [vmem:[%s4898_s1 + $0x478] sm:$0xff] }
  0x2a   :  { %3341 = vmatmul.mubr.msk.f32.gmra.mrb[14].mxu0 %vm216_vm0, %v34_v22  ;;  %3529 = vmatprep.mubr.msk.f32.mxu1 %vm216_vm0, %v159_v54  ;;  %v64_v56 = vld [vmem:[%s4898_s1 + $0x168] sm:$0xff]  ;;  %v161_v58 = vld [vmem:[%s4898_s1 + $0x470] sm:$0xff]  ;;  %v66_v60 = vld [vmem:[%s4898_s1 + $0x178] sm:$0xff] }
  0x2b   :  { %3343 = vmatprep.mubr.msk.f32.mxu0 %vm216_vm0, %v35_v23  ;;  %v67_v61 = vld [vmem:[%s4898_s1 + $0x180] sm:$0xff]  ;;  %v164_v63 = vld [vmem:[%s4898_s1 + $0x488] sm:$0xff]  ;;  %v69_v1 = vld [vmem:[%s4898_s1 + $0x190] sm:$0xff] }
  0x2c   :  { %v163_v62 = vld [vmem:[%s4898_s1 + $0x480] sm:$0xff]  ;;  %v68_v0 = vld [vmem:[%s4898_s1 + $0x188] sm:$0xff]  ;;  %v165_v2 = vld [vmem:[%s4898_s1 + $0x490] sm:$0xff] }
  0x2d   :  { %3530 = vmatmul.mubr.msk.f32.gmra.mrb[2].mxu1 %vm216_vm0, %v160_v55  ;;  %v166_v3 = vld [vmem:[%s4898_s1 + $0x498] sm:$0xff]  ;;  %v71_v5 = vld [vmem:[%s4898_s1 + $0x1a0] sm:$0xff]  ;;  %v168_v7 = vld [vmem:[%s4898_s1 + $0x4a8] sm:$0xff] }
  0x2e   :  { %3344 = vmatmul.mubr.msk.f32.gmra.mrb[16].mxu0 %vm216_vm0, %v36_v24  ;;  %3532 = vmatprep.mubr.msk.f32.mxu1 %vm216_vm0, %v161_v58  ;;  %v70_v4 = vld [vmem:[%s4898_s1 + $0x198] sm:$0xff]  ;;  %v167_v6 = vld [vmem:[%s4898_s1 + $0x4a0] sm:$0xff]  ;;  %v72_v8 = vld [vmem:[%s4898_s1 + $0x1a8] sm:$0xff] }
  0x2f   :  { %3346 = vmatprep.mubr.msk.f32.mxu0 %vm216_vm0, %v37_v25  ;;  %v73_v9 = vld [vmem:[%s4898_s1 + $0x1b0] sm:$0xff]  ;;  %v170_v11 = vld [vmem:[%s4898_s1 + $0x4b8] sm:$0xff]  ;;  %v75_v13 = vld [vmem:[%s4898_s1 + $0x1c0] sm:$0xff] }
  0x30   :  { %v169_v10 = vld [vmem:[%s4898_s1 + $0x4b0] sm:$0xff]  ;;  %v74_v12 = vld [vmem:[%s4898_s1 + $0x1b8] sm:$0xff]  ;;  %v171_v14 = vld [vmem:[%s4898_s1 + $0x4c0] sm:$0xff] }
  0x31   :  { %3533 = vmatmul.mubr.msk.f32.gmra.mrb[4].mxu1 %vm216_vm0, %v162_v59  ;;  %v172_v15 = vld [vmem:[%s4898_s1 + $0x4c8] sm:$0xff]  ;;  %v77_v17 = vld [vmem:[%s4898_s1 + $0x1d0] sm:$0xff]  ;;  %v174_v19 = vld [vmem:[%s4898_s1 + $0x4d8] sm:$0xff] }
  0x32   :  { %3347 = vmatmul.mubr.msk.f32.gmra.mrb[18].mxu0 %vm216_vm0, %v38_v26  ;;  %3535 = vmatprep.mubr.msk.f32.mxu1 %vm216_vm0, %v163_v62  ;;  %v76_v16 = vld [vmem:[%s4898_s1 + $0x1c8] sm:$0xff]  ;;  %v173_v18 = vld [vmem:[%s4898_s1 + $0x4d0] sm:$0xff]  ;;  %v78_v20 = vld [vmem:[%s4898_s1 + $0x1d8] sm:$0xff] }
  0x33   :  { %3349 = vmatprep.mubr.msk.f32.mxu0 %vm216_vm0, %v39_v27  ;;  %v79_v21 = vld [vmem:[%s4898_s1 + $0x1e0] sm:$0xff]  ;;  %v176_v23 = vld [vmem:[%s4898_s1 + $0x4e8] sm:$0xff]  ;;  %v81_v25 = vld [vmem:[%s4898_s1 + $0x1f0] sm:$0xff] }
  0x34   :  { %v175_v22 = vld [vmem:[%s4898_s1 + $0x4e0] sm:$0xff]  ;;  %v80_v24 = vld [vmem:[%s4898_s1 + $0x1e8] sm:$0xff]  ;;  %v177_v26 = vld [vmem:[%s4898_s1 + $0x4f0] sm:$0xff] }
  0x35   :  { %3536 = vmatmul.mubr.msk.f32.gmra.mrb[6].mxu1 %vm216_vm0, %v164_v63  ;;  %v178_v27 = vld [vmem:[%s4898_s1 + $0x4f8] sm:$0xff]  ;;  %v93_v49 = vld [vmem:[%s4898_s1 + $0x250] sm:$0xff]  ;;  %v191_v54 = vld [vmem:[%s4898_s1 + $0x560] sm:$0xff] }
  0x36   :  { %3350 = vmatmul.mubr.msk.f32.gmra.mrb[20].mxu0 %vm216_vm0, %v40_v28  ;;  %3538 = vmatprep.mubr.msk.f32.mxu1 %vm216_vm0, %v165_v2  ;;  %v82_v28 = vld [vmem:[%s4898_s1 + $0x1f8] sm:$0xff]  ;;  %v192_v55 = vld [vmem:[%s4898_s1 + $0x568] sm:$0xff]  ;;  %v193_v58 = vld [vmem:[%s4898_s1 + $0x570] sm:$0xff] }
  0x37   :  { %3352 = vmatprep.mubr.msk.f32.mxu0 %vm216_vm0, %v41_v29  ;;  %v83_v29 = vld [vmem:[%s4898_s1 + $0x200] sm:$0xff]  ;;  %v190_v51 = vld [vmem:[%s4898_s1 + $0x558] sm:$0xff]  ;;  %v196_v63 = vld [vmem:[%s4898_s1 + $0x588] sm:$0xff] }
  0x38   :  { %v194_v59 = vld [vmem:[%s4898_s1 + $0x578] sm:$0xff]  ;;  %v195_v62 = vld [vmem:[%s4898_s1 + $0x580] sm:$0xff]  ;;  %v197_v2 = vld [vmem:[%s4898_s1 + $0x590] sm:$0xff] }
  0x39   :  { %3539 = vmatmul.mubr.msk.f32.gmra.mrb[8].mxu1 %vm216_vm0, %v166_v3  ;;  %v198_v3 = vld [vmem:[%s4898_s1 + $0x598] sm:$0xff] }
  0x3a   :  { %3353 = vmatmul.mubr.msk.f32.gmra.mrb[22].mxu0 %vm216_vm0, %v42_v30  ;;  %3541 = vmatprep.mubr.msk.f32.mxu1 %vm216_vm0, %v167_v6  ;;  %v179_v30 = vld [vmem:[%s4898_s1 + $0x500] sm:$0xff] }
  0x3b   :  { %3355 = vmatprep.mubr.msk.f32.mxu0 %vm216_vm0, %v43_v31  ;;  %v180_v31 = vld [vmem:[%s4898_s1 + $0x508] sm:$0xff]  ;;  %v199_v6 = vld [vmem:[%s4898_s1 + $0x5a0] sm:$0xff] }
  0x3d   :  { %3542 = vmatmul.mubr.msk.f32.gmra.mrb[10].mxu1 %vm216_vm0, %v168_v7  ;;  %v200_v7 = vld [vmem:[%s4898_s1 + $0x5a8] sm:$0xff] }
  0x3e   :  { %3356 = vmatmul.mubr.msk.f32.gmra.mrb[24].mxu0 %vm216_vm0, %v44_v32  ;;  %3544 = vmatprep.mubr.msk.f32.mxu1 %vm216_vm0, %v169_v10  ;;  %v84_v32 = vld [vmem:[%s4898_s1 + $0x208] sm:$0xff]  ;;  %v201_v10 = vld [vmem:[%s4898_s1 + $0x5b0] sm:$0xff] }
  0x3f   :  { %3358 = vmatprep.mubr.msk.f32.mxu0 %vm216_vm0, %v45_v33  ;;  %v85_v33 = vld [vmem:[%s4898_s1 + $0x210] sm:$0xff] }
  0x41   :  { %3545 = vmatmul.mubr.msk.f32.gmra.mrb[12].mxu1 %vm216_vm0, %v170_v11  ;;  %v202_v11 = vld [vmem:[%s4898_s1 + $0x5b8] sm:$0xff] }
  0x42   :  { %3359 = vmatmul.mubr.msk.f32.gmra.mrb[26].mxu0 %vm216_vm0, %v46_v34  ;;  %3547 = vmatprep.mubr.msk.f32.mxu1 %vm216_vm0, %v171_v14  ;;  %v181_v34 = vld [vmem:[%s4898_s1 + $0x510] sm:$0xff]  ;;  %v203_v14 = vld [vmem:[%s4898_s1 + $0x5c0] sm:$0xff] }
  0x43   :  { %3361 = vmatprep.mubr.msk.f32.mxu0 %vm216_vm0, %v47_v35  ;;  %v182_v35 = vld [vmem:[%s4898_s1 + $0x518] sm:$0xff] }
  0x45   :  { %3548 = vmatmul.mubr.msk.f32.gmra.mrb[14].mxu1 %vm216_vm0, %v172_v15  ;;  %v204_v15 = vld [vmem:[%s4898_s1 + $0x5c8] sm:$0xff] }
  0x46   :  { %3362 = vmatmul.mubr.msk.f32.gmra.mrb[28].mxu0 %vm216_vm0, %v48_v36  ;;  %3550 = vmatprep.mubr.msk.f32.mxu1 %vm216_vm0, %v173_v18  ;;  %v86_v36 = vld [vmem:[%s4898_s1 + $0x218] sm:$0xff]  ;;  %v205_v18 = vld [vmem:[%s4898_s1 + $0x5d0] sm:$0xff] }
  0x47   :  { %3364 = vmatprep.mubr.msk.f32.mxu0 %vm216_vm0, %v49_v37  ;;  %v87_v37 = vld [vmem:[%s4898_s1 + $0x220] sm:$0xff] }
  0x49   :  { %3551 = vmatmul.mubr.msk.f32.gmra.mrb[16].mxu1 %vm216_vm0, %v174_v19  ;;  %v206_v19 = vld [vmem:[%s4898_s1 + $0x5d8] sm:$0xff] }
  0x4a   :  { %3365 = vmatmul.mubr.msk.f32.gmra.mrb[30].mxu0 %vm216_vm0, %v50_v38  ;;  %3553 = vmatprep.mubr.msk.f32.mxu1 %vm216_vm0, %v175_v22  ;;  %v183_v38 = vld [vmem:[%s4898_s1 + $0x520] sm:$0xff] }
  0x4b   :  { %3367 = vmatprep.mubr.msk.f32.mxu0 %vm216_vm0, %v51_v39  ;;  %v184_v39 = vld [vmem:[%s4898_s1 + $0x528] sm:$0xff]  ;;  %v207_v22 = vld [vmem:[%s4898_s1 + $0x5e0] sm:$0xff] }
  0x4d   :  { %3554 = vmatmul.mubr.msk.f32.gmra.mrb[18].mxu1 %vm216_vm0, %v176_v23  ;;  %v208_v23 = vld [vmem:[%s4898_s1 + $0x5e8] sm:$0xff] }
  0x4e   :  { %3368 = vmatmul.mubr.msk.f32.gmra.mrb[32].mxu0 %vm216_vm0, %v52_v40  ;;  %3556 = vmatprep.mubr.msk.f32.mxu1 %vm216_vm0, %v177_v26  ;;  %v88_v40 = vld [vmem:[%s4898_s1 + $0x228] sm:$0xff] }
  0x4f   :  { %3370 = vmatprep.mubr.msk.f32.mxu0 %vm216_vm0, %v53_v41  ;;  %v89_v41 = vld [vmem:[%s4898_s1 + $0x230] sm:$0xff] }
  0x51   :  { %3557 = vmatmul.mubr.msk.f32.gmra.mrb[20].mxu1 %vm216_vm0, %v178_v27  ;;  %v113_v27 = vld [vmem:[%s4898_s1 + $0x2f0] sm:$0xff] }
  0x52   :  { %3371 = vmatmul.mubr.msk.f32.gmra.mrb[34].mxu0 %vm216_vm0, %v54_v42  ;;  %3559 = vmatprep.mubr.msk.f32.mxu1 %vm216_vm0, %v179_v30  ;;  %v185_v42 = vld [vmem:[%s4898_s1 + $0x530] sm:$0xff] }
  0x53   :  { %3373 = vmatprep.mubr.msk.f32.mxu0 %vm216_vm0, %v55_v43  ;;  %v186_v43 = vld [vmem:[%s4898_s1 + $0x538] sm:$0xff] }
  0x55   :  { %3560 = vmatmul.mubr.msk.f32.gmra.mrb[22].mxu1 %vm216_vm0, %v180_v31  ;;  %v4485_v31 = vld [vmem:[%s4899_s2] sm:$0xff] }
  0x56   :  { %3374 = vmatmul.mubr.msk.f32.gmra.mrb[36].mxu0 %vm216_vm0, %v56_v44  ;;  %3562 = vmatprep.mubr.msk.f32.mxu1 %vm216_vm0, %v181_v34  ;;  %v90_v44 = vld [vmem:[%s4898_s1 + $0x238] sm:$0xff]  ;;  %v115_v34 = vld [vmem:[%s4898_s1 + $0x300] sm:$0xff] }
  0x57   :  { %3376 = vmatprep.mubr.msk.f32.mxu0 %vm216_vm0, %v57_v45  ;;  %v91_v45 = vld [vmem:[%s4898_s1 + $0x240] sm:$0xff] }
  0x59   :  { %3563 = vmatmul.mubr.msk.f32.gmra.mrb[24].mxu1 %vm216_vm0, %v182_v35  ;;  %v116_v35 = vld [vmem:[%s4898_s1 + $0x308] sm:$0xff] }
  0x5a   :  { %3377 = vmatmul.mubr.msk.f32.gmra.mrb[38].mxu0 %vm216_vm0, %v58_v46  ;;  %3565 = vmatprep.mubr.msk.f32.mxu1 %vm216_vm0, %v183_v38  ;;  %v187_v46 = vld [vmem:[%s4898_s1 + $0x540] sm:$0xff] }
  0x5b   :  { %3379 = vmatprep.mubr.msk.f32.mxu0 %vm216_vm0, %v59_v47  ;;  %v188_v47 = vld [vmem:[%s4898_s1 + $0x548] sm:$0xff]  ;;  %v119_v38 = vld [vmem:[%s4898_s1 + $0x320] sm:$0xff] }
  0x5d   :  { %3566 = vmatmul.mubr.msk.f32.gmra.mrb[26].mxu1 %vm216_vm0, %v184_v39  ;;  %v120_v39 = vld [vmem:[%s4898_s1 + $0x328] sm:$0xff] }
  0x5e   :  { %3380 = vmatmul.mubr.msk.f32.gmra.mrb[40].mxu0 %vm216_vm0, %v60_v48  ;;  %3568 = vmatprep.mubr.msk.f32.mxu1 %vm216_vm0, %v185_v42  ;;  %v92_v48 = vld [vmem:[%s4898_s1 + $0x248] sm:$0xff]  ;;  %v123_v42 = vld [vmem:[%s4898_s1 + $0x340] sm:$0xff] }
  0x5f   :  { %3382 = vmatprep.mubr.msk.f32.mxu0 %vm216_vm0, %v61_v50  ;;  %v189_v50 = vld [vmem:[%s4898_s1 + $0x550] sm:$0xff] }
  0x61   :  { %3569 = vmatmul.mubr.msk.f32.gmra.mrb[28].mxu1 %vm216_vm0, %v186_v43  ;;  %v124_v43 = vld [vmem:[%s4898_s1 + $0x348] sm:$0xff] }
  0x62   :  { %3383 = vmatmul.mubr.msk.f32.gmra.mrb[42].mxu0 %vm216_vm0, %v62_v52  ;;  %3571 = vmatprep.mubr.msk.f32.mxu1 %vm216_vm0, %v187_v46  ;;  %v94_v52 = vld [vmem:[%s4898_s1 + $0x258] sm:$0xff]  ;;  %v127_v46 = vld [vmem:[%s4898_s1 + $0x360] sm:$0xff] }
  0x63   :  { %3385 = vmatprep.mubr.msk.f32.mxu0 %vm216_vm0, %v63_v53  ;;  %v95_v53 = vld [vmem:[%s4898_s1 + $0x260] sm:$0xff] }
  0x65   :  { %3572 = vmatmul.mubr.msk.f32.gmra.mrb[30].mxu1 %vm216_vm0, %v188_v47 }
  0x66   :  { %3386 = vmatmul.mubr.msk.f32.gmra.mrb[44].mxu0 %vm216_vm0, %v64_v56  ;;  %3574 = vmatprep.mubr.msk.f32.mxu1 %vm216_vm0, %v189_v50  ;;  %v96_v56 = vld [vmem:[%s4898_s1 + $0x268] sm:$0xff] }
  0x67   :  { %3388 = vmatprep.mubr.msk.f32.mxu0 %vm216_vm0, %v65_v57  ;;  %v97_v57 = vld [vmem:[%s4898_s1 + $0x270] sm:$0xff] }
  0x69   :  { %3575 = vmatmul.mubr.msk.f32.gmra.mrb[32].mxu1 %vm216_vm0, %v190_v51  ;;  %v128_v51 = vld [vmem:[%s4898_s1 + $0x368] sm:$0xff] }
  0x6a   :  { %3389 = vmatmul.mubr.msk.f32.gmra.mrb[46].mxu0 %vm216_vm0, %v66_v60  ;;  %3577 = vmatprep.mubr.msk.f32.mxu1 %vm216_vm0, %v191_v54  ;;  %v98_v60 = vld [vmem:[%s4898_s1 + $0x278] sm:$0xff] }
  0x6b   :  { %3391 = vmatprep.mubr.msk.f32.mxu0 %vm216_vm0, %v67_v61  ;;  %v99_v61 = vld [vmem:[%s4898_s1 + $0x280] sm:$0xff] }
  0x6d   :  { %3578 = vmatmul.mubr.msk.f32.gmra.mrb[34].mxu1 %vm216_vm0, %v192_v55 }
  0x6e   :  { %3392 = vmatmul.mubr.msk.f32.gmra.mrb[48].mxu0 %vm216_vm0, %v68_v0  ;;  %3580 = vmatprep.mubr.msk.f32.mxu1 %vm216_vm0, %v193_v58  ;;  %v100_v0 = vld [vmem:[%s4898_s1 + $0x288] sm:$0xff] }
  0x6f   :  { %3394 = vmatprep.mubr.msk.f32.mxu0 %vm216_vm0, %v69_v1  ;;  %v101_v1 = vld [vmem:[%s4898_s1 + $0x290] sm:$0xff] }
  0x71   :  { %3581 = vmatmul.mubr.msk.f32.gmra.mrb[36].mxu1 %vm216_vm0, %v194_v59 }
  0x72   :  { %3395 = vmatmul.mubr.msk.f32.gmra.mrb[50].mxu0 %vm216_vm0, %v70_v4  ;;  %3583 = vmatprep.mubr.msk.f32.mxu1 %vm216_vm0, %v195_v62  ;;  %v102_v4 = vld [vmem:[%s4898_s1 + $0x298] sm:$0xff]  ;;  %v131_v62 = vld [vmem:[%s4898_s1 + $0x380] sm:$0xff] }
  0x73   :  { %3397 = vmatprep.mubr.msk.f32.mxu0 %vm216_vm0, %v71_v5  ;;  %v103_v5 = vld [vmem:[%s4898_s1 + $0x2a0] sm:$0xff] }
  0x75   :  { %3584 = vmatmul.mubr.msk.f32.gmra.mrb[38].mxu1 %vm216_vm0, %v196_v63 }
  0x76   :  { %3398 = vmatmul.mubr.msk.f32.gmra.mrb[52].mxu0 %vm216_vm0, %v72_v8  ;;  %3586 = vmatprep.mubr.msk.f32.mxu1 %vm216_vm0, %v197_v2  ;;  %v104_v8 = vld [vmem:[%s4898_s1 + $0x2a8] sm:$0xff] }
  0x77   :  { %3400 = vmatprep.mubr.msk.f32.mxu0 %vm216_vm0, %v73_v9  ;;  %v105_v9 = vld [vmem:[%s4898_s1 + $0x2b0] sm:$0xff] }
  0x79   :  { %3587 = vmatmul.mubr.msk.f32.gmra.mrb[40].mxu1 %vm216_vm0, %v198_v3 }
  0x7a   :  { %3401 = vmatmul.mubr.msk.f32.gmra.mrb[54].mxu0 %vm216_vm0, %v74_v12  ;;  %3589 = vmatprep.mubr.msk.f32.mxu1 %vm216_vm0, %v199_v6  ;;  %v106_v12 = vld [vmem:[%s4898_s1 + $0x2b8] sm:$0xff] }
  0x7b   :  { %3403 = vmatprep.mubr.msk.f32.mxu0 %vm216_vm0, %v75_v13  ;;  %v107_v13 = vld [vmem:[%s4898_s1 + $0x2c0] sm:$0xff] }
  0x7d   :  { %3590 = vmatmul.mubr.msk.f32.gmra.mrb[42].mxu1 %vm216_vm0, %v200_v7  ;;  %v133_v7 = vld [vmem:[%s4898_s1 + $0x390] sm:$0xff] }
  0x7e   :  { %3404 = vmatmul.mubr.msk.f32.gmra.mrb[56].mxu0 %vm216_vm0, %v76_v16  ;;  %3592 = vmatprep.mubr.msk.f32.mxu1 %vm216_vm0, %v201_v10  ;;  %v108_v16 = vld [vmem:[%s4898_s1 + $0x2c8] sm:$0xff] }
  0x7f   :  { %3406 = vmatprep.mubr.msk.f32.mxu0 %vm216_vm0, %v77_v17  ;;  %v109_v17 = vld [vmem:[%s4898_s1 + $0x2d0] sm:$0xff] }
  0x81   :  { %3593 = vmatmul.mubr.msk.f32.gmra.mrb[44].mxu1 %vm216_vm0, %v202_v11 }
  0x82   :  { %3407 = vmatmul.mubr.msk.f32.gmra.mrb[58].mxu0 %vm216_vm0, %v78_v20  ;;  %3595 = vmatprep.mubr.msk.f32.mxu1 %vm216_vm0, %v203_v14  ;;  %v110_v20 = vld [vmem:[%s4898_s1 + $0x2d8] sm:$0xff] }
  0x83   :  { %3409 = vmatprep.mubr.msk.f32.mxu0 %vm216_vm0, %v79_v21  ;;  %v111_v21 = vld [vmem:[%s4898_s1 + $0x2e0] sm:$0xff]  ;;  %v134_v14 = vld [vmem:[%s4898_s1 + $0x398] sm:$0xff] }
  0x85   :  { %3596 = vmatmul.mubr.msk.f32.gmra.mrb[46].mxu1 %vm216_vm0, %v204_v15 }
  0x86   :  { %3410 = vmatmul.mubr.msk.f32.gmra.mrb[60].mxu0 %vm216_vm0, %v80_v24  ;;  %3598 = vmatprep.mubr.msk.f32.mxu1 %vm216_vm0, %v205_v18  ;;  %v2208_v24 = vlaneseq }
  0x87   :  { %3412 = vmatprep.mubr.msk.f32.mxu0 %vm216_vm0, %v81_v25  ;;  %v112_v25 = vld [vmem:[%s4898_s1 + $0x2e8] sm:$0xff] }
  0x88   :  { %v4467_v26 = vshrl.u32 %v2208_v24, 7 }
  0x89   :  { %3599 = vmatmul.mubr.msk.f32.gmra.mrb[48].mxu1 %vm216_vm0, %v206_v19 }
  0x8a   :  { %3413 = vmatmul.mubr.msk.f32.gmra.mrb[62].mxu0 %vm216_vm0, %v82_v28  ;;  %3601 = vmatprep.mubr.msk.f32.mxu1 %vm216_vm0, %v207_v22  ;;  %v209_v28 = vld [vmem:[%s4898_s1 + $0x5f0] sm:$0xff]  ;;  %v2214_v30 = vsub.s32 1, %v4467_v26 }
  0x8b   :  { %3415 = vmatprep.mubr.msk.f32.mxu0 %vm216_vm0, %v83_v29  ;;  %v210_v29 = vld [vmem:[%s4898_s1 + $0x5f8] sm:$0xff] }
  0x8d   :  { %3602 = vmatmul.mubr.msk.f32.gmra.mrb[50].mxu1 %vm216_vm0, %v208_v23  ;;  %v136_v23 = vld [vmem:[%s4898_s1 + $0x3a8] sm:$0xff] }
  0x8e   :  { %3416 = vmatmul.mubr.msk.f32.gmra.mrb[64].mxu0 %vm216_vm0, %v84_v32  ;;  %3604 = vmatprep.mubr.msk.f32.mxu1 %vm216_vm0, %v209_v28  ;;  %v114_v32 = vld [vmem:[%s4898_s1 + $0x2f8] sm:$0xff] }
  0x8f   :  { %3418 = vmatprep.mubr.msk.f32.mxu0 %vm216_vm0, %v85_v33  ;;  %v2215_v33 = vrot.slane %v4485_v31, %v2214_v30 }
  0x91   :  { %3605 = vmatmul.mubr.msk.f32.gmra.mrb[52].mxu1 %vm216_vm0, %v210_v29 }
  0x92   :  { %3419 = vmatmul.mubr.msk.f32.gmra.mrb[66].mxu0 %vm216_vm0, %v86_v36  ;;  %2332 = vmatprep.mubr.f32.mxu1 %v2215_v33  ;;  %v117_v36 = vld [vmem:[%s4898_s1 + $0x310] sm:$0xff] }
  0x93   :  { %3421 = vmatprep.mubr.msk.f32.mxu0 %vm216_vm0, %v87_v37  ;;  %v118_v37 = vld [vmem:[%s4898_s1 + $0x318] sm:$0xff] }
  0x96   :  { %3422 = vmatmul.mubr.msk.f32.gmra.mrb[68].mxu0 %vm216_vm0, %v88_v40  ;;  %v121_v40 = vld [vmem:[%s4898_s1 + $0x330] sm:$0xff] }
  0x97   :  { %3424 = vmatprep.mubr.msk.f32.mxu0 %vm216_vm0, %v89_v41  ;;  %v122_v41 = vld [vmem:[%s4898_s1 + $0x338] sm:$0xff] }
  0x9a   :  { %3425 = vmatmul.mubr.msk.f32.gmra.mrb[70].mxu0 %vm216_vm0, %v90_v44  ;;  %v125_v44 = vld [vmem:[%s4898_s1 + $0x350] sm:$0xff] }
  0x9b   :  { %3427 = vmatprep.mubr.msk.f32.mxu0 %vm216_vm0, %v91_v45  ;;  %v126_v45 = vld [vmem:[%s4898_s1 + $0x358] sm:$0xff] }
  0x9e   :  { %3428 = vmatmul.mubr.msk.f32.gmra.mrb[72].mxu0 %vm216_vm0, %v92_v48 }
  0x9f   :  { %3430 = vmatprep.mubr.msk.f32.mxu0 %vm216_vm0, %v93_v49 }
  0xa2   :  { %3431 = vmatmul.mubr.msk.f32.gmra.mrb[74].mxu0 %vm216_vm0, %v94_v52 }
  0xa3   :  { %3433 = vmatprep.mubr.msk.f32.mxu0 %vm216_vm0, %v95_v53  ;;  %v129_v53 = vld [vmem:[%s4898_s1 + $0x370] sm:$0xff] }
  0xa6   :  { %3434 = vmatmul.mubr.msk.f32.gmra.mrb[76].mxu0 %vm216_vm0, %v96_v56 }
  0xa7   :  { %3436 = vmatprep.mubr.msk.f32.mxu0 %vm216_vm0, %v97_v57 }
  0xaa   :  { %3437 = vmatmul.mubr.msk.f32.gmra.mrb[78].mxu0 %vm216_vm0, %v98_v60  ;;  %v130_v60 = vld [vmem:[%s4898_s1 + $0x378] sm:$0xff] }
  0xab   :  { %3439 = vmatprep.mubr.msk.f32.mxu0 %vm216_vm0, %v99_v61 }
  0xae   :  { %3440 = vmatmul.mubr.msk.f32.gmra.mrb[80].mxu0 %vm216_vm0, %v100_v0 }
  0xaf   :  { %3442 = vmatprep.mubr.msk.f32.mxu0 %vm216_vm0, %v101_v1 }
  0xb2   :  { %3443 = vmatmul.mubr.msk.f32.gmra.mrb[82].mxu0 %vm216_vm0, %v102_v4 }
  0xb3   :  { %3445 = vmatprep.mubr.msk.f32.mxu0 %vm216_vm0, %v103_v5  ;;  %v132_v5 = vld [vmem:[%s4898_s1 + $0x388] sm:$0xff] }
  0xb6   :  { %3446 = vmatmul.mubr.msk.f32.gmra.mrb[84].mxu0 %vm216_vm0, %v104_v8 }
  0xb7   :  { %3448 = vmatprep.mubr.msk.f32.mxu0 %vm216_vm0, %v105_v9 }
  0xba   :  { %3449 = vmatmul.mubr.msk.f32.gmra.mrb[86].mxu0 %vm216_vm0, %v106_v12 }
  0xbb   :  { %3451 = vmatprep.mubr.msk.f32.mxu0 %vm216_vm0, %v107_v13 }
  0xbe   :  { %3452 = vmatmul.mubr.msk.f32.gmra.mrb[88].mxu0 %vm216_vm0, %v108_v16  ;;  %v135_v16 = vld [vmem:[%s4898_s1 + $0x3a0] sm:$0xff] }
  0xbf   :  { %3454 = vmatprep.mubr.msk.f32.mxu0 %vm216_vm0, %v109_v17 }
  0xc2   :  { %3455 = vmatmul.mubr.msk.f32.gmra.mrb[90].mxu0 %vm216_vm0, %v110_v20 }
  0xc3   :  { %3457 = vmatprep.mubr.msk.f32.mxu0 %vm216_vm0, %v111_v21 }
  0xc6   :  { %3458 = vmatmul.mubr.msk.f32.gmra.mrb[92].mxu0 %vm216_vm0, %v112_v25  ;;  %v137_v25 = vld [vmem:[%s4898_s1 + $0x3b0] sm:$0xff] }
  0xc7   :  { %3460 = vmatprep.mubr.msk.f32.mxu0 %vm216_vm0, %v113_v27 }
  0xca   :  { %3461 = vmatmul.mubr.msk.f32.gmra.mrb[94].mxu0 %vm216_vm0, %v114_v32 }
  0xcb   :  { %3463 = vmatprep.mubr.msk.f32.mxu0 %vm216_vm0, %v115_v34 }
  0xce   :  { %3464 = vmatmul.mubr.msk.f32.gmra.mrb[96].mxu0 %vm216_vm0, %v116_v35  ;;  %v138_v35 = vld [vmem:[%s4898_s1 + $0x3b8] sm:$0xff] }
  0xcf   :  { %3466 = vmatprep.mubr.msk.f32.mxu0 %vm216_vm0, %v117_v36 }
  0xd2   :  { %3467 = vmatmul.mubr.msk.f32.gmra.mrb[98].mxu0 %vm216_vm0, %v118_v37  ;;  %v139_v37 = vld [vmem:[%s4898_s1 + $0x3c0] sm:$0xff] }
  0xd3   :  { %3469 = vmatprep.mubr.msk.f32.mxu0 %vm216_vm0, %v119_v38 }
  0xd6   :  { %3470 = vmatmul.mubr.msk.f32.gmra.mrb[100].mxu0 %vm216_vm0, %v120_v39 }
  0xd7   :  { %3472 = vmatprep.mubr.msk.f32.mxu0 %vm216_vm0, %v121_v40 }
  0xda   :  { %3473 = vmatmul.mubr.msk.f32.gmra.mrb[102].mxu0 %vm216_vm0, %v122_v41 }
  0xdb   :  { %3475 = vmatprep.mubr.msk.f32.mxu0 %vm216_vm0, %v123_v42 }
  0xde   :  { %3476 = vmatmul.mubr.msk.f32.gmra.mrb[104].mxu0 %vm216_vm0, %v124_v43 }
  0xdf   :  { %3478 = vmatprep.mubr.msk.f32.mxu0 %vm216_vm0, %v125_v44  ;;  %v140_v44 = vld [vmem:[%s4898_s1 + $0x3c8] sm:$0xff] }
  0xe1   :  { %v3321_v47 = vpop.f32.mrb[0].mxu0 }
  0xe2   :  { %v1819_v48 = vmul.f32 0.01, %v3321_v47  ;;  %v859_v49 = vpop.f32.mrb[1].mxu0  ;;  %3479 = vmatmul.mubr.msk.f32.gmra.mrb[106].mxu0 %vm216_vm0, %v126_v45 }
  0xe3   :  { %v1818_v50 = vmul.f32 0.01, %v859_v49  ;;  %3481 = vmatprep.mubr.msk.f32.mxu0 %vm216_vm0, %v127_v46  ;;  %v141_v46 = vld [vmem:[%s4898_s1 + $0x3d0] sm:$0xff] }
  0xe4   :  { %v2011_v52 = vmax.f32 %v3321_v47, %v1819_v48 }
  0xe5   :  { %v2010_v54 = vmax.f32 %v859_v49, %v1818_v50  ;;  %v3324_v55 = vpop.f32.mrb[2].mxu0 }
  0xe6   :  { %v1821_v56 = vmul.f32 0.01, %v3324_v55  ;;  %v869_v57 = vpop.f32.mrb[3].mxu0  ;;  %3482 = vmatmul.mubr.msk.f32.gmra.mrb[108].mxu0 %vm216_vm0, %v128_v51 }
  0xe7   :  { %v4554_v58 = vpack.c.bf16 %v2011_v52, %v2010_v54  ;;  %v1820_v59 = vmul.f32 0.01, %v869_v57  ;;  %3484 = vmatprep.mubr.msk.f32.mxu0 %vm216_vm0, %v129_v53  ;;  %v142_v53 = vld [vmem:[%s4898_s1 + $0x3d8] sm:$0xff] }
  0xe8   :  { %v2013_v61 = vmax.f32 %v3324_v55, %v1821_v56  ;;  %v143_v55 = vld [vmem:[%s4898_s1 + $0x3e0] sm:$0xff] }
  0xe9   :  { %v2012_v63 = vmax.f32 %v869_v57, %v1820_v59  ;;  %v3327_v0 = vpop.f32.mrb[4].mxu0 }
  0xea   :  { %v1823_v1 = vmul.f32 0.01, %v3327_v0  ;;  %v879_v2 = vpop.f32.mrb[5].mxu0  ;;  %3485 = vmatmul.mubr.msk.f32.gmra.mrb[110].mxu0 %vm216_vm0, %v130_v60 }
  0xeb   :  { %v4564_v3 = vpack.c.bf16 %v2013_v61, %v2012_v63  ;;  %v1822_v4 = vmul.f32 0.01, %v879_v2  ;;  %3487 = vmatprep.mubr.msk.f32.mxu0 %vm216_vm0, %v131_v62  ;;  %v144_v63 = vld [vmem:[%s4898_s1 + $0x3e8] sm:$0xff] }
  0xec   :  { %v2015_v6 = vmax.f32 %v3327_v0, %v1823_v1  ;;  %v145_v1 = vld [vmem:[%s4898_s1 + $0x3f0] sm:$0xff] }
  0xed   :  { %v2014_v8 = vmax.f32 %v879_v2, %v1822_v4  ;;  %v3330_v9 = vpop.f32.mrb[6].mxu0 }
  0xee   :  { %v1825_v10 = vmul.f32 0.01, %v3330_v9  ;;  %v889_v11 = vpop.f32.mrb[7].mxu0  ;;  %3488 = vmatmul.mubr.msk.f32.gmra.mrb[112].mxu0 %vm216_vm0, %v132_v5 }
  0xef   :  { %v4574_v12 = vpack.c.bf16 %v2015_v6, %v2014_v8  ;;  %v1824_v13 = vmul.f32 0.01, %v889_v11  ;;  %3490 = vmatprep.mubr.msk.f32.mxu0 %vm216_vm0, %v133_v7 }
  0xf0   :  { %v2017_v15 = vmax.f32 %v3330_v9, %v1825_v10  ;;  %v146_v9 = vld [vmem:[%s4898_s1 + $0x3f8] sm:$0xff] }
  0xf1   :  { %v2016_v17 = vmax.f32 %v889_v11, %v1824_v13  ;;  %v3333_v18 = vpop.f32.mrb[8].mxu0  ;;  %v147_v11 = vld [vmem:[%s4898_s1 + $0x400] sm:$0xff] }
  0xf2   :  { %v1827_v19 = vmul.f32 0.01, %v3333_v18  ;;  %v899_v20 = vpop.f32.mrb[9].mxu0  ;;  %3491 = vmatmul.mubr.msk.f32.gmra.mrb[114].mxu0 %vm216_vm0, %v134_v14 }
  0xf3   :  { %v4584_v21 = vpack.c.bf16 %v2017_v15, %v2016_v17  ;;  %v1826_v22 = vmul.f32 0.01, %v899_v20  ;;  %3493 = vmatprep.mubr.msk.f32.mxu0 %vm216_vm0, %v135_v16 }
  0xf4   :  { %v2019_v24 = vmax.f32 %v3333_v18, %v1827_v19  ;;  %v148_v19 = vld [vmem:[%s4898_s1 + $0x408] sm:$0xff] }
  0xf5   :  { %v2018_v27 = vmax.f32 %v899_v20, %v1826_v22  ;;  %v3336_v28 = vpop.f32.mrb[10].mxu0  ;;  %v149_v22 = vld [vmem:[%s4898_s1 + $0x410] sm:$0xff] }
  0xf6   :  { %v1829_v29 = vmul.f32 0.01, %v3336_v28  ;;  %v909_v32 = vpop.f32.mrb[11].mxu0  ;;  %3494 = vmatmul.mubr.msk.f32.gmra.mrb[116].mxu0 %vm216_vm0, %v136_v23 }
  0xf7   :  { %v4594_v33 = vpack.c.bf16 %v2019_v24, %v2018_v27  ;;  %v1828_v34 = vmul.f32 0.01, %v909_v32  ;;  %3496 = vmatprep.mubr.msk.f32.mxu0 %vm216_vm0, %v137_v25 }
  0xf8   :  { %v2021_v36 = vmax.f32 %v3336_v28, %v1829_v29  ;;  %v150_v29 = vld [vmem:[%s4898_s1 + $0x418] sm:$0xff] }
  0xf9   :  { %v2020_v38 = vmax.f32 %v909_v32, %v1828_v34  ;;  %v3339_v39 = vpop.f32.mrb[12].mxu0  ;;  %v151_v34 = vld [vmem:[%s4898_s1 + $0x420] sm:$0xff] }
  0xfa   :  { %v1831_v40 = vmul.f32 0.01, %v3339_v39  ;;  %v919_v41 = vpop.f32.mrb[13].mxu0  ;;  %3497 = vmatmul.mubr.msk.f32.gmra.mrb[118].mxu0 %vm216_vm0, %v138_v35 }
  0xfb   :  { %v4604_v42 = vpack.c.bf16 %v2021_v36, %v2020_v38  ;;  %v1830_v43 = vmul.f32 0.01, %v919_v41  ;;  %3499 = vmatprep.mubr.msk.f32.mxu0 %vm216_vm0, %v139_v37 }
  0xfc   :  { %v2023_v45 = vmax.f32 %v3339_v39, %v1831_v40  ;;  %v152_v40 = vld [vmem:[%s4898_s1 + $0x428] sm:$0xff] }
  0xfd   :  { %v2022_v47 = vmax.f32 %v919_v41, %v1830_v43  ;;  %v3342_v48 = vpop.f32.mrb[14].mxu0  ;;  %v153_v43 = vld [vmem:[%s4898_s1 + $0x430] sm:$0xff] }
  0xfe   :  { %v1833_v49 = vmul.f32 0.01, %v3342_v48  ;;  %v929_v50 = vpop.f32.mrb[15].mxu0  ;;  %3500 = vmatmul.mubr.msk.f32.gmra.mrb[120].mxu0 %vm216_vm0, %v140_v44 }
  0xff   :  { %v4614_v51 = vpack.c.bf16 %v2023_v45, %v2022_v47  ;;  %v1832_v52 = vmul.f32 0.01, %v929_v50  ;;  %3502 = vmatprep.mubr.msk.f32.mxu0 %vm216_vm0, %v141_v46 }
 0x100   :  { %v2025_v54 = vmax.f32 %v3342_v48, %v1833_v49  ;;  %v154_v49 = vld [vmem:[%s4898_s1 + $0x438] sm:$0xff] }
 0x101   :  { %v2024_v56 = vmax.f32 %v929_v50, %v1832_v52  ;;  %v3345_v57 = vpop.f32.mrb[16].mxu0  ;;  %v155_v52 = vld [vmem:[%s4898_s1 + $0x440] sm:$0xff] }
 0x102   :  { %v1835_v59 = vmul.f32 0.01, %v3345_v57  ;;  %v939_v60 = vpop.f32.mrb[17].mxu0  ;;  %3503 = vmatmul.mubr.msk.f32.gmra.mrb[122].mxu0 %vm216_vm0, %v142_v53 }
 0x103   :  { %v4624_v61 = vpack.c.bf16 %v2025_v54, %v2024_v56  ;;  %v1834_v62 = vmul.f32 0.01, %v939_v60  ;;  %3505 = vmatprep.mubr.msk.f32.mxu0 %vm216_vm0, %v143_v55 }
 0x104   :  { %v2027_v0 = vmax.f32 %v3345_v57, %v1835_v59  ;;  %v156_v59 = vld [vmem:[%s4898_s1 + $0x448] sm:$0xff] }
 0x105   :  { %v2026_v2 = vmax.f32 %v939_v60, %v1834_v62  ;;  %v3348_v4 = vpop.f32.mrb[18].mxu0 }
 0x106   :  { %v1837_v5 = vmul.f32 0.01, %v3348_v4  ;;  %v949_v6 = vpop.f32.mrb[19].mxu0  ;;  %3506 = vmatmul.mubr.msk.f32.gmra.mrb[124].mxu0 %vm216_vm0, %v144_v63 }
 0x107   :  { %v3615_v7 = vpack.c.bf16 %v2027_v0, %v2026_v2  ;;  %v1836_v8 = vmul.f32 0.01, %v949_v6  ;;  %3508 = vmatprep.mubr.msk.f32.mxu0 %vm216_vm0, %v145_v1 }
 0x108   :  { %v2029_v10 = vmax.f32 %v3348_v4, %v1837_v5 }
 0x109   :  { %v2028_v13 = vmax.f32 %v949_v6, %v1836_v8  ;;  %v3351_v14 = vpop.f32.mrb[20].mxu0  ;;  %3616 = vmatprep.subr.bf16.mxu1 %v3615_v7  ;;  %v2210_v7 = vsub.s32 0, %v4467_v26 }
 0x10a   :  { %v1839_v15 = vmul.f32 0.01, %v3351_v14  ;;  %v959_v16 = vpop.f32.mrb[21].mxu0  ;;  %3509 = vmatmul.mubr.msk.f32.gmra.mrb[126].mxu0 %vm216_vm0, %v146_v9  ;;  %3618 = vmatpush3.bf16.msra.mxu1 %v4554_v58 }
 0x10b   :  { %v3619_v17 = vpack.c.bf16 %v2029_v10, %v2028_v13  ;;  %v1838_v18 = vmul.f32 0.01, %v959_v16  ;;  %3511 = vmatprep.mubr.msk.f32.mxu0 %vm216_vm0, %v147_v11  ;;  %v2222_v10 = vsub.s32 3, %v4467_v26 }
 0x10c   :  { %v2031_v20 = vmax.f32 %v3351_v14, %v1839_v15 }
 0x10d   :  { %v2030_v23 = vmax.f32 %v959_v16, %v1838_v18  ;;  %v3354_v24 = vpop.f32.mrb[22].mxu0  ;;  %3620 = vmatprep.subr.bf16.mxu1 %v3619_v17 }
 0x10e   :  { %v1841_v25 = vmul.f32 0.01, %v3354_v24  ;;  %v969_v27 = vpop.f32.mrb[23].mxu0  ;;  %3512 = vmatmul.mubr.msk.f32.gmra.mrb[128].mxu0 %vm216_vm0, %v148_v19  ;;  %3622 = vmatpush3.bf16.msra.mxu1 %v4564_v3 }
 0x10f   :  { %v3623_v58 = vpack.c.bf16 %v2031_v20, %v2030_v23  ;;  %v1840_v28 = vmul.f32 0.01, %v969_v27  ;;  %3514 = vmatprep.mubr.msk.f32.mxu0 %vm216_vm0, %v149_v22 }
 0x110   :  { %v2033_v32 = vmax.f32 %v3354_v24, %v1841_v25 }
 0x111   :  { %v2032_v35 = vmax.f32 %v969_v27, %v1840_v28  ;;  %v3357_v36 = vpop.f32.mrb[24].mxu0  ;;  %3624 = vmatprep.subr.bf16.mxu1 %v3623_v58 }
 0x112   :  { %v1843_v37 = vmul.f32 0.01, %v3357_v36  ;;  %v979_v38 = vpop.f32.mrb[25].mxu0  ;;  %3515 = vmatmul.mubr.msk.f32.gmra.mrb[130].mxu0 %vm216_vm0, %v150_v29  ;;  %3626 = vmatpush3.bf16.msra.mxu1 %v4574_v12 }
 0x113   :  { %v3627_v3 = vpack.c.bf16 %v2033_v32, %v2032_v35  ;;  %v1842_v39 = vmul.f32 0.01, %v979_v38  ;;  %3517 = vmatprep.mubr.msk.f32.mxu0 %vm216_vm0, %v151_v34 }
 0x114   :  { %v2035_v41 = vmax.f32 %v3357_v36, %v1843_v37 }
 0x115   :  { %v2034_v44 = vmax.f32 %v979_v38, %v1842_v39  ;;  %v3360_v45 = vpop.f32.mrb[26].mxu0  ;;  %3628 = vmatprep.subr.bf16.mxu1 %v3627_v3 }
 0x116   :  { %v1845_v46 = vmul.f32 0.01, %v3360_v45  ;;  %v989_v47 = vpop.f32.mrb[27].mxu0  ;;  %3518 = vmatmul.mubr.msk.f32.gmra.mrb[132].mxu0 %vm216_vm0, %v152_v40  ;;  %3630 = vmatpush3.bf16.msra.mxu1 %v4584_v21 }
 0x117   :  { %v3631_v12 = vpack.c.bf16 %v2035_v41, %v2034_v44  ;;  %v1844_v48 = vmul.f32 0.01, %v989_v47  ;;  %3520 = vmatprep.mubr.msk.f32.mxu0 %vm216_vm0, %v153_v43  ;;  %v3528_v43 = vpop.f32.mrb[0].mxu1 }
 0x118   :  { %v2037_v50 = vmax.f32 %v3360_v45, %v1845_v46  ;;  %v1549_v46 = vpop.f32.mrb[1].mxu1 }
 0x119   :  { %v2036_v53 = vmax.f32 %v989_v47, %v1844_v48  ;;  %v3363_v54 = vpop.f32.mrb[28].mxu0  ;;  %3632 = vmatprep.subr.bf16.mxu1 %v3631_v12  ;;  %v1957_v12 = vmul.f32 0.01, %v3528_v43  ;;  %v1956_v48 = vmul.f32 0.01, %v1549_v46 }
 0x11a   :  { %v1847_v55 = vmul.f32 0.01, %v3363_v54  ;;  %v999_v56 = vpop.f32.mrb[29].mxu0  ;;  %3521 = vmatmul.mubr.msk.f32.gmra.mrb[134].mxu0 %vm216_vm0, %v154_v49  ;;  %3634 = vmatpush3.bf16.msra.mxu1 %v4594_v33 }
 0x11b   :  { %v3635_v21 = vpack.c.bf16 %v2037_v50, %v2036_v53  ;;  %v1846_v57 = vmul.f32 0.01, %v999_v56  ;;  %3523 = vmatprep.mubr.msk.f32.mxu0 %vm216_vm0, %v155_v52 }
 0x11c   :  { %v2039_v60 = vmax.f32 %v3363_v54, %v1847_v55  ;;  %v2149_v54 = vmax.f32 %v3528_v43, %v1957_v12  ;;  %v2148_v55 = vmax.f32 %v1549_v46, %v1956_v48 }
 0x11d   :  { %v2038_v62 = vmax.f32 %v999_v56, %v1846_v57  ;;  %v3366_v63 = vpop.f32.mrb[30].mxu0  ;;  %3636 = vmatprep.subr.bf16.mxu1 %v3635_v21  ;;  %v3531_v56 = vpop.f32.mrb[2].mxu1 }
 0x11e   :  { %v1849_v0 = vmul.f32 0.01, %v3366_v63  ;;  %v1009_v1 = vpop.f32.mrb[31].mxu0  ;;  %3524 = vmatmul.mubr.msk.f32.gmra.mrb[136].mxu0 %vm216_vm0, %v156_v59  ;;  %3638 = vmatpush3.bf16.msra.mxu1 %v4604_v42  ;;  %v2211_v42 = vrot.slane %v4485_v31, %v2210_v7  ;;  %v1559_v59 = vpop.f32.mrb[3].mxu1 }
 0x11f   :  { %v3639_v2 = vpack.c.bf16 %v2039_v60, %v2038_v62  ;;  %v1848_v33 = vmul.f32 0.01, %v1009_v1  ;;  %v4705_v62 = vpack.c.bf16 %v2149_v54, %v2148_v55 }
 0x120   :  { %v2041_v4 = vmax.f32 %v3366_v63, %v1849_v0  ;;  %v1959_v63 = vmul.f32 0.01, %v3531_v56  ;;  %v1958_v0 = vmul.f32 0.01, %v1559_v59 }
 0x121   :  { %v2040_v5 = vmax.f32 %v1009_v1, %v1848_v33  ;;  %v3369_v6 = vpop.f32.mrb[32].mxu0  ;;  %3640 = vmatprep.subr.bf16.mxu1 %v3639_v2 }
 0x122   :  { %v1851_v8 = vmul.f32 0.01, %v3369_v6  ;;  %v1019_v9 = vpop.f32.mrb[33].mxu0  ;;  %3642 = vmatpush3.bf16.msra.mxu1 %v4614_v51  ;;  %v2223_v51 = vrot.slane %v4485_v31, %v2222_v10 }
 0x123   :  { %v3643_v11 = vpack.c.bf16 %v2041_v4, %v2040_v5  ;;  %v1850_v13 = vmul.f32 0.01, %v1019_v9  ;;  %v2151_v5 = vmax.f32 %v3531_v56, %v1959_v63 }
 0x124   :  { %v2043_v14 = vmax.f32 %v3369_v6, %v1851_v8  ;;  %v2150_v6 = vmax.f32 %v1559_v59, %v1958_v0  ;;  %v3534_v8 = vpop.f32.mrb[4].mxu1 }
 0x125   :  { %v2042_v15 = vmax.f32 %v1019_v9, %v1850_v13  ;;  %v3372_v16 = vpop.f32.mrb[34].mxu0  ;;  %3644 = vmatprep.subr.bf16.mxu1 %v3643_v11  ;;  %v1569_v13 = vpop.f32.mrb[5].mxu1 }
 0x126   :  { %v1853_v17 = vmul.f32 0.01, %v3372_v16  ;;  %v1029_v18 = vpop.f32.mrb[35].mxu0  ;;  %3646 = vmatpush3.bf16.msra.mxu1 %v4624_v61 }
 0x127   :  { %v4695_v19 = vpack.c.bf16 %v2043_v14, %v2042_v15  ;;  %v1852_v20 = vmul.f32 0.01, %v1029_v18  ;;  %v4709_v15 = vpack.c.bf16 %v2151_v5, %v2150_v6 }
 0x128   :  { %v2045_v22 = vmax.f32 %v3372_v16, %v1853_v17  ;;  %v1961_v16 = vmul.f32 0.01, %v3534_v8 }
 0x129   :  { %v2044_v23 = vmax.f32 %v1029_v18, %v1852_v20  ;;  %v3375_v24 = vpop.f32.mrb[36].mxu0  ;;  %2333 = vmatmul.mubr.f32.vlgmr.msra.gmra.mrb[54].mxu1 %v2211_v42  ;;  %v1960_v42 = vmul.f32 0.01, %v1569_v13 }
 0x12a   :  { %v1855_v25 = vmul.f32 0.01, %v3375_v24  ;;  %v1039_v27 = vpop.f32.mrb[37].mxu0  ;;  %2402 = vmatprep.mubr.f32.mxu1 %v2223_v51 }
 0x12b   :  { %v4697_v58 = vpack.c.bf16 %v2045_v22, %v2044_v23  ;;  %v1854_v28 = vmul.f32 0.01, %v1039_v27  ;;  %v2153_v22 = vmax.f32 %v3534_v8, %v1961_v16  ;;  %v2152_v23 = vmax.f32 %v1569_v13, %v1960_v42 }
 0x12c   :  { %v2047_v29 = vmax.f32 %v3375_v24, %v1855_v25  ;;  %v3537_v24 = vpop.f32.mrb[6].mxu1 }
 0x12d   :  { %v2046_v32 = vmax.f32 %v1039_v27, %v1854_v28  ;;  %v3378_v61 = vpop.f32.mrb[38].mxu0  ;;  %v1579_v28 = vpop.f32.mrb[7].mxu1 }
 0x12e   :  { %v1857_v34 = vmul.f32 0.01, %v3378_v61  ;;  %v1049_v35 = vpop.f32.mrb[39].mxu0 }
 0x12f   :  { %v4699_v36 = vpack.c.bf16 %v2047_v29, %v2046_v32  ;;  %v1856_v37 = vmul.f32 0.01, %v1049_v35  ;;  %v4713_v32 = vpack.c.bf16 %v2153_v22, %v2152_v23 }
 0x130   :  { %v2049_v38 = vmax.f32 %v3378_v61, %v1857_v34  ;;  %v1963_v61 = vmul.f32 0.01, %v3537_v24  ;;  %v1962_v34 = vmul.f32 0.01, %v1579_v28 }
 0x131   :  { %v2048_v3 = vmax.f32 %v1049_v35, %v1856_v37  ;;  %v3381_v39 = vpop.f32.mrb[40].mxu0 }
 0x132   :  { %v1859_v40 = vmul.f32 0.01, %v3381_v39  ;;  %v1059_v41 = vpop.f32.mrb[41].mxu0 }
 0x133   :  { %v4701_v44 = vpack.c.bf16 %v2049_v38, %v2048_v3  ;;  %v1858_v45 = vmul.f32 0.01, %v1059_v41 }
 0x134   :  { %v2051_v47 = vmax.f32 %v3381_v39, %v1859_v40  ;;  %v2155_v39 = vmax.f32 %v3537_v24, %v1963_v61  ;;  %v2154_v40 = vmax.f32 %v1579_v28, %v1962_v34 }
 0x135   :  { %v2050_v49 = vmax.f32 %v1059_v41, %v1858_v45  ;;  %v3384_v50 = vpop.f32.mrb[42].mxu0  ;;  %v3540_v41 = vpop.f32.mrb[8].mxu1 }
 0x136   :  { %v1861_v52 = vmul.f32 0.01, %v3384_v50  ;;  %v1069_v53 = vpop.f32.mrb[43].mxu0  ;;  %v1589_v46 = vpop.f32.mrb[9].mxu1  ;;  %v4717_v12 = vpack.c.bf16 %v2155_v39, %v2154_v40  ;;  %v1965_v48 = vmul.f32 0.01, %v3540_v41 }
 0x137   :  { %v4703_v21 = vpack.c.bf16 %v2051_v47, %v2050_v49  ;;  %v1860_v57 = vmul.f32 0.01, %v1069_v53  ;;  %v1964_v49 = vmul.f32 0.01, %v1589_v46 }
 0x138   :  { %v2053_v60 = vmax.f32 %v3384_v50, %v1861_v52  ;;  %v2157_v55 = vmax.f32 %v3540_v41, %v1965_v48 }
 0x139   :  { %v2052_v1 = vmax.f32 %v1069_v53, %v1860_v57  ;;  %v3387_v2 = vpop.f32.mrb[44].mxu0  ;;  %v2156_v56 = vmax.f32 %v1589_v46, %v1964_v49  ;;  %v3543_v57 = vpop.f32.mrb[10].mxu1 }
 0x13a   :  { %v1863_v33 = vmul.f32 0.01, %v3387_v2  ;;  %v1079_v4 = vpop.f32.mrb[45].mxu0  ;;  %v1599_v63 = vpop.f32.mrb[11].mxu1 }
 0x13b   :  { %v4707_v9 = vpack.c.bf16 %v2053_v60, %v2052_v1  ;;  %v1862_v11 = vmul.f32 0.01, %v1079_v4  ;;  %v4719_v1 = vpack.c.bf16 %v2157_v55, %v2156_v56 }
 0x13c   :  { %v2055_v14 = vmax.f32 %v3387_v2, %v1863_v33  ;;  %v1967_v2 = vmul.f32 0.01, %v3543_v57  ;;  %v1966_v33 = vmul.f32 0.01, %v1599_v63 }
 0x13d   :  { %v2054_v17 = vmax.f32 %v1079_v4, %v1862_v11  ;;  %v3390_v18 = vpop.f32.mrb[46].mxu0 }
 0x13e   :  { %v1865_v51 = vmul.f32 0.01, %v3390_v18  ;;  %v1089_v20 = vpop.f32.mrb[47].mxu0  ;;  %v2159_v11 = vmax.f32 %v3543_v57, %v1967_v2  ;;  %v2158_v13 = vmax.f32 %v1599_v63, %v1966_v33 }
 0x13f   :  { %v4711_v25 = vpack.c.bf16 %v2055_v14, %v2054_v17  ;;  %v1864_v27 = vmul.f32 0.01, %v1089_v20  ;;  %v3546_v14 = vpop.f32.mrb[12].mxu1 }
 0x140   :  { %v2057_v29 = vmax.f32 %v3390_v18, %v1865_v51  ;;  %v1609_v17 = vpop.f32.mrb[13].mxu1  ;;  %v4722_v51 = vpack.c.bf16 %v2159_v11, %v2158_v13 }
 0x141   :  { %v2056_v35 = vmax.f32 %v1089_v20, %v1864_v27  ;;  %v3393_v37 = vpop.f32.mrb[48].mxu0  ;;  %v1969_v20 = vmul.f32 0.01, %v3546_v14  ;;  %v1968_v22 = vmul.f32 0.01, %v1609_v17  ;;  %v3549_v61 = vpop.f32.mrb[14].mxu1 }
 0x142   :  { %v1867_v38 = vmul.f32 0.01, %v3393_v37  ;;  %v1099_v3 = vpop.f32.mrb[49].mxu0  ;;  %v1971_v39 = vmul.f32 0.01, %v3549_v61 }
 0x143   :  { %v4715_v43 = vpack.c.bf16 %v2057_v29, %v2056_v35  ;;  %v1866_v45 = vmul.f32 0.01, %v1099_v3  ;;  %v2161_v29 = vmax.f32 %v3546_v14, %v1969_v20 }
 0x144   :  { %v2059_v47 = vmax.f32 %v3393_v37, %v1867_v38  ;;  %v1619_v37 = vpop.f32.mrb[15].mxu1  ;;  %v2163_v48 = vmax.f32 %v3549_v61, %v1971_v39 }
 0x145   :  { %v2058_v50 = vmax.f32 %v1099_v3, %v1866_v45  ;;  %v3396_v52 = vpop.f32.mrb[50].mxu0  ;;  %v1970_v40 = vmul.f32 0.01, %v1619_v37  ;;  %v3552_v49 = vpop.f32.mrb[16].mxu1 }
 0x146   :  { %v1869_v53 = vmul.f32 0.01, %v3396_v52  ;;  %v1109_v54 = vpop.f32.mrb[51].mxu0  ;;  %v1973_v56 = vmul.f32 0.01, %v3552_v49 }
 0x147   :  { %v3647_v59 = vpack.c.bf16 %v2059_v47, %v2058_v50  ;;  %v1868_v60 = vmul.f32 0.01, %v1109_v54 }
 0x148   :  { %v2061_v0 = vmax.f32 %v3396_v52, %v1869_v53  ;;  %v1629_v53 = vpop.f32.mrb[17].mxu1  ;;  %v2165_v2 = vmax.f32 %v3552_v49, %v1973_v56 }
 0x149   :  { %v2060_v4 = vmax.f32 %v1109_v54, %v1868_v60  ;;  %v3399_v5 = vpop.f32.mrb[52].mxu0  ;;  %3648 = vmatprep.subr.bf16.mxu1 %v3647_v59  ;;  %v1972_v57 = vmul.f32 0.01, %v1629_v53  ;;  %v3555_v33 = vpop.f32.mrb[18].mxu1 }
 0x14a   :  { %v1871_v6 = vmul.f32 0.01, %v3399_v5  ;;  %v1119_v8 = vpop.f32.mrb[53].mxu0  ;;  %3650 = vmatpush3.bf16.msra.mxu1 %v4695_v19  ;;  %v2160_v19 = vmax.f32 %v1609_v17, %v1968_v22  ;;  %v1975_v13 = vmul.f32 0.01, %v3555_v33 }
 0x14b   :  { %v3651_v16 = vpack.c.bf16 %v2061_v0, %v2060_v4  ;;  %v1870_v42 = vmul.f32 0.01, %v1119_v8 }
 0x14c   :  { %v2063_v18 = vmax.f32 %v3399_v5, %v1871_v6  ;;  %v4725_v3 = vpack.c.bf16 %v2161_v29, %v2160_v19  ;;  %v1639_v6 = vpop.f32.mrb[19].mxu1  ;;  %v2167_v20 = vmax.f32 %v3555_v33, %v1975_v13 }
 0x14d   :  { %v2062_v23 = vmax.f32 %v1119_v8, %v1870_v42  ;;  %v3402_v24 = vpop.f32.mrb[54].mxu0  ;;  %3652 = vmatprep.subr.bf16.mxu1 %v3651_v16  ;;  %v1974_v14 = vmul.f32 0.01, %v1639_v6  ;;  %v3558_v22 = vpop.f32.mrb[20].mxu1 }
 0x14e   :  { %v1873_v27 = vmul.f32 0.01, %v3402_v24  ;;  %v1129_v28 = vpop.f32.mrb[55].mxu0  ;;  %3654 = vmatpush3.bf16.msra.mxu1 %v4697_v58  ;;  %v2162_v58 = vmax.f32 %v1619_v37, %v1970_v40  ;;  %v1977_v19 = vmul.f32 0.01, %v3558_v22 }
 0x14f   :  { %v3655_v34 = vpack.c.bf16 %v2063_v18, %v2062_v23  ;;  %v1872_v35 = vmul.f32 0.01, %v1129_v28 }
 0x150   :  { %v2065_v38 = vmax.f32 %v3402_v24, %v1873_v27  ;;  %v4728_v55 = vpack.c.bf16 %v2163_v48, %v2162_v58  ;;  %v1649_v27 = vpop.f32.mrb[21].mxu1  ;;  %v2169_v39 = vmax.f32 %v3558_v22, %v1977_v19 }
 0x151   :  { %v2064_v41 = vmax.f32 %v1129_v28, %v1872_v35  ;;  %v3405_v45 = vpop.f32.mrb[56].mxu0  ;;  %3656 = vmatprep.subr.bf16.mxu1 %v3655_v34  ;;  %v1976_v61 = vmul.f32 0.01, %v1649_v27  ;;  %v3561_v40 = vpop.f32.mrb[22].mxu1 }
 0x152   :  { %v1875_v46 = vmul.f32 0.01, %v3405_v45  ;;  %v1139_v47 = vpop.f32.mrb[57].mxu0  ;;  %3658 = vmatpush3.bf16.msra.mxu1 %v4699_v36  ;;  %v2164_v36 = vmax.f32 %v1629_v53, %v1972_v57  ;;  %v1979_v58 = vmul.f32 0.01, %v3561_v40  ;;  %v2218_v53 = vsub.s32 2, %v4467_v26 }
 0x153   :  { %v3659_v50 = vpack.c.bf16 %v2065_v38, %v2064_v41  ;;  %v1874_v52 = vmul.f32 0.01, %v1139_v47 }
 0x154   :  { %v2067_v54 = vmax.f32 %v3405_v45, %v1875_v46  ;;  %v4731_v11 = vpack.c.bf16 %v2165_v2, %v2164_v36  ;;  %v1659_v46 = vpop.f32.mrb[23].mxu1  ;;  %v2171_v57 = vmax.f32 %v3561_v40, %v1979_v58 }
 0x155   :  { %v2066_v59 = vmax.f32 %v1139_v47, %v1874_v52  ;;  %v3408_v60 = vpop.f32.mrb[58].mxu0  ;;  %3660 = vmatprep.subr.bf16.mxu1 %v3659_v50  ;;  %v1978_v49 = vmul.f32 0.01, %v1659_v46 }
 0x156   :  { %v1877_v63 = vmul.f32 0.01, %v3408_v60  ;;  %v1149_v0 = vpop.f32.mrb[59].mxu0  ;;  %3662 = vmatpush3.bf16.msra.mxu1 %v4701_v44  ;;  %v2166_v44 = vmax.f32 %v1639_v6, %v1974_v14 }
 0x157   :  { %v3663_v4 = vpack.c.bf16 %v2067_v54, %v2066_v59  ;;  %v1876_v5 = vmul.f32 0.01, %v1149_v0  ;;  %v2170_v59 = vmax.f32 %v1659_v46, %v1978_v49 }
 0x158   :  { %v2069_v8 = vmax.f32 %v3408_v60, %v1877_v63  ;;  %v4734_v29 = vpack.c.bf16 %v2167_v20, %v2166_v44  ;;  %v3564_v60 = vpop.f32.mrb[24].mxu1 }
 0x159   :  { %v2068_v16 = vmax.f32 %v1149_v0, %v1876_v5  ;;  %v3411_v42 = vpop.f32.mrb[60].mxu0  ;;  %3664 = vmatprep.subr.bf16.mxu1 %v3663_v4  ;;  %v1669_v2 = vpop.f32.mrb[25].mxu1  ;;  %v4742_v33 = vpack.c.bf16 %v2171_v57, %v2170_v59  ;;  %v1981_v4 = vmul.f32 0.01, %v3564_v60 }
 0x15a   :  { %v1879_v17 = vmul.f32 0.01, %v3411_v42  ;;  %v1159_v18 = vpop.f32.mrb[61].mxu0  ;;  %3666 = vmatpush3.bf16.msra.mxu1 %v4703_v21  ;;  %v2168_v21 = vmax.f32 %v1649_v27, %v1976_v61  ;;  %v1980_v5 = vmul.f32 0.01, %v1669_v2 }
 0x15b   :  { %v3667_v23 = vpack.c.bf16 %v2069_v8, %v2068_v16  ;;  %v1878_v24 = vmul.f32 0.01, %v1159_v18 }
 0x15c   :  { %v2071_v28 = vmax.f32 %v3411_v42, %v1879_v17  ;;  %v4737_v48 = vpack.c.bf16 %v2169_v39, %v2168_v21  ;;  %v2173_v42 = vmax.f32 %v3564_v60, %v1981_v4  ;;  %v2172_v17 = vmax.f32 %v1669_v2, %v1980_v5 }
 0x15d   :  { %v2070_v34 = vmax.f32 %v1159_v18, %v1878_v24  ;;  %v3414_v35 = vpop.f32.mrb[62].mxu0  ;;  %3668 = vmatprep.subr.bf16.mxu1 %v3667_v23  ;;  %v3567_v18 = vpop.f32.mrb[26].mxu1 }
 0x15e   :  { %v1881_v37 = vmul.f32 0.01, %v3414_v35  ;;  %v1169_v38 = vpop.f32.mrb[63].mxu0  ;;  %3670 = vmatpush3.bf16.msra.mxu1 %v4707_v9  ;;  %v2230_v9 = vsub.s32 5, %v4467_v26  ;;  %v1679_v22 = vpop.f32.mrb[27].mxu1  ;;  %v4751_v24 = vpack.c.bf16 %v2173_v42, %v2172_v17 }
 0x15f   :  { %v3671_v41 = vpack.c.bf16 %v2071_v28, %v2070_v34  ;;  %v1880_v45 = vmul.f32 0.01, %v1169_v38  ;;  %v1983_v27 = vmul.f32 0.01, %v3567_v18  ;;  %v1982_v28 = vmul.f32 0.01, %v1679_v22 }
 0x160   :  { %v2073_v47 = vmax.f32 %v3414_v35, %v1881_v37  ;;  %v2231_v16 = vrot.slane %v4485_v31, %v2230_v9  ;;  %v3570_v37 = vpop.f32.mrb[28].mxu1 }
 0x161   :  { %v2072_v50 = vmax.f32 %v1169_v38, %v1880_v45  ;;  %v3417_v52 = vpop.f32.mrb[64].mxu0  ;;  %3672 = vmatprep.subr.bf16.mxu1 %v3671_v41  ;;  %v1689_v21 = vpop.f32.mrb[29].mxu1  ;;  %v1985_v45 = vmul.f32 0.01, %v3570_v37 }
 0x162   :  { %v1883_v54 = vmul.f32 0.01, %v3417_v52  ;;  %v1179_v56 = vpop.f32.mrb[65].mxu0  ;;  %3674 = vmatpush3.bf16.msra.mxu1 %v4711_v25  ;;  %v2219_v25 = vrot.slane %v4485_v31, %v2218_v53  ;;  %v2174_v31 = vmax.f32 %v1679_v22, %v1982_v28  ;;  %v1984_v46 = vmul.f32 0.01, %v1689_v21 }
 0x163   :  { %v3675_v63 = vpack.c.bf16 %v2073_v47, %v2072_v50  ;;  %v1882_v0 = vmul.f32 0.01, %v1179_v56 }
 0x164   :  { %v2075_v36 = vmax.f32 %v3417_v52, %v1883_v54  ;;  %v2177_v52 = vmax.f32 %v3570_v37, %v1985_v45  ;;  %v2176_v54 = vmax.f32 %v1689_v21, %v1984_v46 }
 0x165   :  { %v2074_v6 = vmax.f32 %v1179_v56, %v1882_v0  ;;  %v3420_v8 = vpop.f32.mrb[66].mxu0  ;;  %3676 = vmatprep.subr.bf16.mxu1 %v3675_v63  ;;  %v3573_v56 = vpop.f32.mrb[30].mxu1 }
 0x166   :  { %v1885_v13 = vmul.f32 0.01, %v3420_v8  ;;  %v1189_v14 = vpop.f32.mrb[67].mxu0  ;;  %3678 = vmatpush3.bf16.msra.mxu1 %v4715_v43  ;;  %v2175_v43 = vmax.f32 %v3567_v18, %v1983_v27  ;;  %v1699_v59 = vpop.f32.mrb[31].mxu1  ;;  %v4759_v63 = vpack.c.bf16 %v2177_v52, %v2176_v54  ;;  %v1987_v0 = vmul.f32 0.01, %v3573_v56 }
 0x167   :  { %v4749_v20 = vpack.c.bf16 %v2075_v36, %v2074_v6  ;;  %v1884_v44 = vmul.f32 0.01, %v1189_v14  ;;  %v1986_v2 = vmul.f32 0.01, %v1699_v59 }
 0x168   :  { %v2077_v23 = vmax.f32 %v3420_v8, %v1885_v13  ;;  %v4755_v41 = vpack.c.bf16 %v2175_v43, %v2174_v31  ;;  %v2179_v8 = vmax.f32 %v3573_v56, %v1987_v0  ;;  %v3576_v13 = vpop.f32.mrb[32].mxu1 }
 0x169   :  { %v2076_v19 = vmax.f32 %v1189_v14, %v1884_v44  ;;  %v3423_v61 = vpop.f32.mrb[68].mxu0  ;;  %2403 = vmatmul.mubr.f32.vlgmr.msra.gmra.mrb[56].mxu1 %v2219_v25  ;;  %v2178_v25 = vmax.f32 %v1699_v59, %v1986_v2  ;;  %v1709_v42 = vpop.f32.mrb[33].mxu1  ;;  %v1989_v44 = vmul.f32 0.01, %v3576_v13 }
 0x16a   :  { %v1887_v34 = vmul.f32 0.01, %v3423_v61  ;;  %v1199_v35 = vpop.f32.mrb[69].mxu0  ;;  %2472 = vmatprep.mubr.f32.mxu1 %v2231_v16  ;;  %v1988_v22 = vmul.f32 0.01, %v1709_v42 }
 0x16b   :  { %v4753_v38 = vpack.c.bf16 %v2077_v23, %v2076_v19  ;;  %v1886_v39 = vmul.f32 0.01, %v1199_v35  ;;  %v4763_v18 = vpack.c.bf16 %v2179_v8, %v2178_v25 }
 0x16c   :  { %v2079_v40 = vmax.f32 %v3423_v61, %v1887_v34  ;;  %v2181_v61 = vmax.f32 %v3576_v13, %v1989_v44  ;;  %v2180_v34 = vmax.f32 %v1709_v42, %v1988_v22 }
 0x16d   :  { %v2078_v47 = vmax.f32 %v1199_v35, %v1886_v39  ;;  %v3426_v58 = vpop.f32.mrb[70].mxu0  ;;  %v3579_v35 = vpop.f32.mrb[34].mxu1 }
 0x16e   :  { %v1889_v49 = vmul.f32 0.01, %v3426_v58  ;;  %v1209_v50 = vpop.f32.mrb[71].mxu0  ;;  %v1991_v37 = vmul.f32 0.01, %v3579_v35  ;;  %v1719_v39 = vpop.f32.mrb[35].mxu1 }
 0x16f   :  { %v4757_v9 = vpack.c.bf16 %v2079_v40, %v2078_v47  ;;  %v1888_v57 = vmul.f32 0.01, %v1209_v50  ;;  %v4767_v40 = vpack.c.bf16 %v2181_v61, %v2180_v34  ;;  %v1990_v45 = vmul.f32 0.01, %v1719_v39 }
 0x170   :  { %v2081_v60 = vmax.f32 %v3426_v58, %v1889_v49  ;;  %v2183_v58 = vmax.f32 %v3579_v35, %v1991_v37  ;;  %v3582_v49 = vpop.f32.mrb[36].mxu1 }
 0x171   :  { %v2080_v36 = vmax.f32 %v1209_v50, %v1888_v57  ;;  %v3429_v4 = vpop.f32.mrb[72].mxu0  ;;  %v2182_v54 = vmax.f32 %v1719_v39, %v1990_v45  ;;  %v1993_v56 = vmul.f32 0.01, %v3582_v49  ;;  %v1729_v57 = vpop.f32.mrb[37].mxu1 }
 0x172   :  { %v1891_v5 = vmul.f32 0.01, %v3429_v4  ;;  %v1219_v6 = vpop.f32.mrb[73].mxu0  ;;  %v1992_v0 = vmul.f32 0.01, %v1729_v57  ;;  %v3585_v25 = vpop.f32.mrb[38].mxu1 }
 0x173   :  { %v4761_v14 = vpack.c.bf16 %v2081_v60, %v2080_v36  ;;  %v1890_v16 = vmul.f32 0.01, %v1219_v6  ;;  %v4771_v36 = vpack.c.bf16 %v2183_v58, %v2182_v54  ;;  %v1995_v42 = vmul.f32 0.01, %v3585_v25 }
 0x174   :  { %v2083_v17 = vmax.f32 %v3429_v4, %v1891_v5  ;;  %v2185_v4 = vmax.f32 %v3582_v49, %v1993_v56  ;;  %v2184_v8 = vmax.f32 %v1729_v57, %v1992_v0 }
 0x175   :  { %v2082_v23 = vmax.f32 %v1219_v6, %v1890_v16  ;;  %v3432_v27 = vpop.f32.mrb[74].mxu0 }
 0x176   :  { %v1893_v28 = vmul.f32 0.01, %v3432_v27  ;;  %v1229_v19 = vpop.f32.mrb[75].mxu0 }
 0x177   :  { %v4765_v43 = vpack.c.bf16 %v2083_v17, %v2082_v23  ;;  %v1892_v31 = vmul.f32 0.01, %v1229_v19  ;;  %v1739_v17 = vpop.f32.mrb[39].mxu1  ;;  %v4775_v23 = vpack.c.bf16 %v2185_v4, %v2184_v8 }
 0x178   :  { %v2085_v21 = vmax.f32 %v3432_v27, %v1893_v28  ;;  %v1994_v27 = vmul.f32 0.01, %v1739_v17 }
 0x179   :  { %v2084_v46 = vmax.f32 %v1229_v19, %v1892_v31  ;;  %v3435_v47 = vpop.f32.mrb[76].mxu0  ;;  %v2187_v19 = vmax.f32 %v3585_v25, %v1995_v42  ;;  %v3588_v31 = vpop.f32.mrb[40].mxu1 }
 0x17a   :  { %v1895_v50 = vmul.f32 0.01, %v3435_v47  ;;  %v1239_v52 = vpop.f32.mrb[77].mxu0  ;;  %v2186_v35 = vmax.f32 %v1739_v17, %v1994_v27  ;;  %v1749_v45 = vpop.f32.mrb[41].mxu1 }
 0x17b   :  { %v4769_v59 = vpack.c.bf16 %v2085_v21, %v2084_v46  ;;  %v1894_v60 = vmul.f32 0.01, %v1239_v52  ;;  %v1997_v21 = vmul.f32 0.01, %v3588_v31  ;;  %v1996_v49 = vmul.f32 0.01, %v1749_v45 }
 0x17c   :  { %v2087_v2 = vmax.f32 %v3435_v47, %v1895_v50  ;;  %v4779_v58 = vpack.c.bf16 %v2187_v19, %v2186_v35 }
 0x17d   :  { %v2086_v5 = vmax.f32 %v1239_v52, %v1894_v60  ;;  %v3438_v6 = vpop.f32.mrb[78].mxu0  ;;  %v2189_v52 = vmax.f32 %v3588_v31, %v1997_v21  ;;  %v2188_v57 = vmax.f32 %v1749_v45, %v1996_v49  ;;  %v3591_v60 = vpop.f32.mrb[42].mxu1 }
 0x17e   :  { %v1897_v13 = vmul.f32 0.01, %v3438_v6  ;;  %v1249_v16 = vpop.f32.mrb[79].mxu0  ;;  %v1999_v4 = vmul.f32 0.01, %v3591_v60 }
 0x17f   :  { %v4773_v44 = vpack.c.bf16 %v2087_v2, %v2086_v5  ;;  %v1896_v22 = vmul.f32 0.01, %v1249_v16  ;;  %v1759_v5 = vpop.f32.mrb[43].mxu1  ;;  %v4781_v25 = vpack.c.bf16 %v2189_v52, %v2188_v57 }
 0x180   :  { %v2089_v28 = vmax.f32 %v3438_v6, %v1897_v13  ;;  %v1998_v13 = vmul.f32 0.01, %v1759_v5  ;;  %v2191_v42 = vmax.f32 %v3591_v60, %v1999_v4 }
 0x181   :  { %v2088_v61 = vmax.f32 %v1249_v16, %v1896_v22  ;;  %v3441_v34 = vpop.f32.mrb[80].mxu0 }
 0x182   :  { %v1899_v37 = vmul.f32 0.01, %v3441_v34  ;;  %v1259_v39 = vpop.f32.mrb[81].mxu0  ;;  %v2190_v27 = vmax.f32 %v1759_v5, %v1998_v13 }
 0x183   :  { %v4777_v46 = vpack.c.bf16 %v2089_v28, %v2088_v61  ;;  %v1898_v47 = vmul.f32 0.01, %v1259_v39  ;;  %v3594_v28 = vpop.f32.mrb[44].mxu1 }
 0x184   :  { %v2091_v50 = vmax.f32 %v3441_v34, %v1899_v37  ;;  %v2001_v34 = vmul.f32 0.01, %v3594_v28  ;;  %v1769_v35 = vpop.f32.mrb[45].mxu1 }
 0x185   :  { %v2090_v54 = vmax.f32 %v1259_v39, %v1898_v47  ;;  %v3444_v56 = vpop.f32.mrb[82].mxu0  ;;  %v4784_v39 = vpack.c.bf16 %v2191_v42, %v2190_v27  ;;  %v2000_v21 = vmul.f32 0.01, %v1769_v35 }
 0x186   :  { %v1901_v0 = vmul.f32 0.01, %v3444_v56  ;;  %v1269_v2 = vpop.f32.mrb[83].mxu0  ;;  %v2193_v47 = vmax.f32 %v3594_v28, %v2001_v34 }
 0x187   :  { %v3679_v6 = vpack.c.bf16 %v2091_v50, %v2090_v54  ;;  %v1900_v8 = vmul.f32 0.01, %v1269_v2  ;;  %v2192_v52 = vmax.f32 %v1769_v35, %v2000_v21  ;;  %v3597_v54 = vpop.f32.mrb[46].mxu1 }
 0x188   :  { %v2093_v16 = vmax.f32 %v3444_v56, %v1901_v0  ;;  %v2003_v60 = vmul.f32 0.01, %v3597_v54 }
 0x189   :  { %v2092_v17 = vmax.f32 %v1269_v2, %v1900_v8  ;;  %v3447_v22 = vpop.f32.mrb[84].mxu0  ;;  %3680 = vmatprep.subr.bf16.mxu1 %v3679_v6  ;;  %v4787_v4 = vpack.c.bf16 %v2193_v47, %v2192_v52 }
 0x18a   :  { %v1903_v19 = vmul.f32 0.01, %v3447_v22  ;;  %v1279_v61 = vpop.f32.mrb[85].mxu0  ;;  %3682 = vmatpush3.bf16.msra.mxu1 %v4749_v20  ;;  %v1779_v20 = vpop.f32.mrb[47].mxu1  ;;  %v2195_v8 = vmax.f32 %v3597_v54, %v2003_v60 }
 0x18b   :  { %v3683_v31 = vpack.c.bf16 %v2093_v16, %v2092_v17  ;;  %v1902_v37 = vmul.f32 0.01, %v1279_v61  ;;  %v2002_v5 = vmul.f32 0.01, %v1779_v20  ;;  %v3600_v17 = vpop.f32.mrb[48].mxu1 }
 0x18c   :  { %v2095_v45 = vmax.f32 %v3447_v22, %v1903_v19  ;;  %v2005_v28 = vmul.f32 0.01, %v3600_v17 }
 0x18d   :  { %v2094_v49 = vmax.f32 %v1279_v61, %v1902_v37  ;;  %v3450_v50 = vpop.f32.mrb[86].mxu0  ;;  %3684 = vmatprep.subr.bf16.mxu1 %v3683_v31  ;;  %v2194_v42 = vmax.f32 %v1779_v20, %v2002_v5 }
 0x18e   :  { %v1905_v56 = vmul.f32 0.01, %v3450_v50  ;;  %v1289_v57 = vpop.f32.mrb[87].mxu0  ;;  %3686 = vmatpush3.bf16.msra.mxu1 %v4753_v38  ;;  %v1789_v38 = vpop.f32.mrb[49].mxu1  ;;  %v2197_v37 = vmax.f32 %v3600_v17, %v2005_v28 }
 0x18f   :  { %v3687_v0 = vpack.c.bf16 %v2095_v45, %v2094_v49  ;;  %v1904_v2 = vmul.f32 0.01, %v1289_v57  ;;  %v4790_v34 = vpack.c.bf16 %v2195_v8, %v2194_v42  ;;  %v2004_v35 = vmul.f32 0.01, %v1789_v38  ;;  %v3603_v49 = vpop.f32.mrb[50].mxu1 }
 0x190   :  { %v2097_v6 = vmax.f32 %v3450_v50, %v1905_v56  ;;  %v2007_v54 = vmul.f32 0.01, %v3603_v49 }
 0x191   :  { %v2096_v13 = vmax.f32 %v1289_v57, %v1904_v2  ;;  %v3453_v16 = vpop.f32.mrb[88].mxu0  ;;  %3688 = vmatprep.subr.bf16.mxu1 %v3687_v0  ;;  %v2196_v47 = vmax.f32 %v1789_v38, %v2004_v35 }
 0x192   :  { %v1907_v22 = vmul.f32 0.01, %v3453_v16  ;;  %v1299_v27 = vpop.f32.mrb[89].mxu0  ;;  %3690 = vmatpush3.bf16.msra.mxu1 %v4757_v9  ;;  %v1799_v9 = vpop.f32.mrb[51].mxu1  ;;  %v2199_v2 = vmax.f32 %v3603_v49, %v2007_v54 }
 0x193   :  { %v3691_v19 = vpack.c.bf16 %v2097_v6, %v2096_v13  ;;  %v1906_v61 = vmul.f32 0.01, %v1299_v27  ;;  %v4793_v60 = vpack.c.bf16 %v2197_v37, %v2196_v47  ;;  %v2006_v20 = vmul.f32 0.01, %v1799_v9  ;;  %v3606_v13 = vpop.f32.mrb[52].mxu1 }
 0x194   :  { %v2099_v31 = vmax.f32 %v3453_v16, %v1907_v22  ;;  %v2009_v17 = vmul.f32 0.01, %v3606_v13 }
 0x195   :  { %v2098_v21 = vmax.f32 %v1299_v27, %v1906_v61  ;;  %v3456_v45 = vpop.f32.mrb[90].mxu0  ;;  %3692 = vmatprep.subr.bf16.mxu1 %v3691_v19  ;;  %v2198_v8 = vmax.f32 %v1799_v9, %v2006_v20  ;;  %v2226_v9 = vsub.s32 4, %v4467_v26  ;;  %v2238_v20 = vsub.s32 7, %v4467_v26 }
 0x196   :  { %v1909_v50 = vmul.f32 0.01, %v3456_v45  ;;  %v1309_v52 = vpop.f32.mrb[91].mxu0  ;;  %3694 = vmatpush3.bf16.msra.mxu1 %v4761_v14  ;;  %v1809_v14 = vpop.f32.mrb[53].mxu1  ;;  %v2201_v61 = vmax.f32 %v3606_v13, %v2009_v17 }
 0x197   :  { %v3695_v56 = vpack.c.bf16 %v2099_v31, %v2098_v21  ;;  %v1908_v57 = vmul.f32 0.01, %v1309_v52  ;;  %v4796_v28 = vpack.c.bf16 %v2199_v2, %v2198_v8  ;;  %v2008_v38 = vmul.f32 0.01, %v1809_v14  ;;  %v4807_v8 = vld [vmem:[%s4899_s2] sm:$0xff] }
 0x198   :  { %v2101_v0 = vmax.f32 %v3456_v45, %v1909_v50  ;;  %v2227_v13 = vrot.slane %v4807_v8, %v2226_v9 }
 0x199   :  { %v2100_v5 = vmax.f32 %v1309_v52, %v1908_v57  ;;  %v3459_v6 = vpop.f32.mrb[92].mxu0  ;;  %3696 = vmatprep.subr.bf16.mxu1 %v3695_v56  ;;  %v2200_v37 = vmax.f32 %v1809_v14, %v2008_v38 }
 0x19a   :  { %v1911_v16 = vmul.f32 0.01, %v3459_v6  ;;  %v1319_v42 = vpop.f32.mrb[93].mxu0  ;;  %3698 = vmatpush3.bf16.msra.mxu1 %v4765_v43 }
 0x19b   :  { %v3699_v22 = vpack.c.bf16 %v2101_v0, %v2100_v5  ;;  %v1910_v27 = vmul.f32 0.01, %v1319_v42  ;;  %v4799_v43 = vpack.c.bf16 %v2201_v61, %v2200_v37 }
 0x19c   :  { %v2103_v19 = vmax.f32 %v3459_v6, %v1911_v16 }
 0x19d   :  { %v2102_v35 = vmax.f32 %v1319_v42, %v1910_v27  ;;  %v3462_v31 = vpop.f32.mrb[94].mxu0  ;;  %3700 = vmatprep.subr.bf16.mxu1 %v3699_v22 }
 0x19e   :  { %v1913_v21 = vmul.f32 0.01, %v3462_v31  ;;  %v1329_v45 = vpop.f32.mrb[95].mxu0  ;;  %3702 = vmatpush3.bf16.msra.mxu1 %v4769_v59 }
 0x19f   :  { %v3703_v47 = vpack.c.bf16 %v2103_v19, %v2102_v35  ;;  %v1912_v49 = vmul.f32 0.01, %v1329_v45 }
 0x1a0   :  { %v2105_v50 = vmax.f32 %v3462_v31, %v1913_v21 }
 0x1a1   :  { %v2104_v52 = vmax.f32 %v1329_v45, %v1912_v49  ;;  %v3465_v54 = vpop.f32.mrb[96].mxu0  ;;  %3704 = vmatprep.subr.bf16.mxu1 %v3703_v47 }
 0x1a2   :  { %v1915_v56 = vmul.f32 0.01, %v3465_v54  ;;  %v1339_v57 = vpop.f32.mrb[97].mxu0  ;;  %3706 = vmatpush3.bf16.msra.mxu1 %v4773_v44  ;;  %v2239_v44 = vrot.slane %v4807_v8, %v2238_v20 }
 0x1a3   :  { %v3707_v0 = vpack.c.bf16 %v2105_v50, %v2104_v52  ;;  %v1914_v2 = vmul.f32 0.01, %v1339_v57 }
 0x1a4   :  { %v2107_v5 = vmax.f32 %v3465_v54, %v1915_v56 }
 0x1a5   :  { %v2106_v59 = vmax.f32 %v1339_v57, %v1914_v2  ;;  %v3468_v6 = vpop.f32.mrb[98].mxu0  ;;  %3708 = vmatprep.subr.bf16.mxu1 %v3707_v0 }
 0x1a6   :  { %v1917_v16 = vmul.f32 0.01, %v3468_v6  ;;  %v1349_v42 = vpop.f32.mrb[99].mxu0  ;;  %3710 = vmatpush3.bf16.msra.mxu1 %v4777_v46 }
 0x1a7   :  { %v4812_v17 = vpack.c.bf16 %v2107_v5, %v2106_v59  ;;  %v1916_v14 = vmul.f32 0.01, %v1349_v42 }
 0x1a8   :  { %v2109_v22 = vmax.f32 %v3468_v6, %v1917_v16 }
 0x1a9   :  { %v2108_v27 = vmax.f32 %v1349_v42, %v1916_v14  ;;  %v3471_v38 = vpop.f32.mrb[100].mxu0  ;;  %2473 = vmatmul.mubr.f32.vlgmr.msra.gmra.mrb[58].mxu1 %v2227_v13 }
 0x1aa   :  { %v1919_v19 = vmul.f32 0.01, %v3471_v38  ;;  %v1359_v61 = vpop.f32.mrb[101].mxu0  ;;  %2542 = vmatprep.mubr.f32.mxu1 %v2239_v44 }
 0x1ab   :  { %v4814_v35 = vpack.c.bf16 %v2109_v22, %v2108_v27  ;;  %v1918_v31 = vmul.f32 0.01, %v1359_v61 }
 0x1ac   :  { %v2111_v37 = vmax.f32 %v3471_v38, %v1919_v19 }
 0x1ad   :  { %v2110_v21 = vmax.f32 %v1359_v61, %v1918_v31  ;;  %v3474_v45 = vpop.f32.mrb[102].mxu0 }
 0x1ae   :  { %v1921_v47 = vmul.f32 0.01, %v3474_v45  ;;  %v1369_v46 = vpop.f32.mrb[103].mxu0 }
 0x1af   :  { %v4816_v49 = vpack.c.bf16 %v2111_v37, %v2110_v21  ;;  %v1920_v50 = vmul.f32 0.01, %v1369_v46 }
 0x1b0   :  { %v2113_v52 = vmax.f32 %v3474_v45, %v1921_v47 }
 0x1b1   :  { %v2112_v54 = vmax.f32 %v1369_v46, %v1920_v50  ;;  %v3477_v9 = vpop.f32.mrb[104].mxu0 }
 0x1b2   :  { %v1923_v56 = vmul.f32 0.01, %v3477_v9  ;;  %v1379_v57 = vpop.f32.mrb[105].mxu0 }
 0x1b3   :  { %v4818_v20 = vpack.c.bf16 %v2113_v52, %v2112_v54  ;;  %v1922_v0 = vmul.f32 0.01, %v1379_v57 }
 0x1b4   :  { %v2115_v2 = vmax.f32 %v3477_v9, %v1923_v56 }
 0x1b5   :  { %v2114_v5 = vmax.f32 %v1379_v57, %v1922_v0  ;;  %v3480_v59 = vpop.f32.mrb[106].mxu0 }
 0x1b6   :  { %v1925_v6 = vmul.f32 0.01, %v3480_v59  ;;  %v1389_v13 = vpop.f32.mrb[107].mxu0 }
 0x1b7   :  { %v4820_v16 = vpack.c.bf16 %v2115_v2, %v2114_v5  ;;  %v1924_v42 = vmul.f32 0.01, %v1389_v13 }
 0x1b8   :  { %v2117_v44 = vmax.f32 %v3480_v59, %v1925_v6 }
 0x1b9   :  { %v2116_v14 = vmax.f32 %v1389_v13, %v1924_v42  ;;  %v3483_v22 = vpop.f32.mrb[108].mxu0 }
 0x1ba   :  { %v1927_v27 = vmul.f32 0.01, %v3483_v22  ;;  %v1399_v38 = vpop.f32.mrb[109].mxu0 }
 0x1bb   :  { %v4822_v19 = vpack.c.bf16 %v2117_v44, %v2116_v14  ;;  %v1926_v61 = vmul.f32 0.01, %v1399_v38 }
 0x1bc   :  { %v2119_v31 = vmax.f32 %v3483_v22, %v1927_v27 }
 0x1bd   :  { %v2118_v37 = vmax.f32 %v1399_v38, %v1926_v61  ;;  %v3486_v21 = vpop.f32.mrb[110].mxu0 }
 0x1be   :  { %v1929_v45 = vmul.f32 0.01, %v3486_v21  ;;  %v1409_v47 = vpop.f32.mrb[111].mxu0 }
 0x1bf   :  { %v4824_v46 = vpack.c.bf16 %v2119_v31, %v2118_v37  ;;  %v1928_v50 = vmul.f32 0.01, %v1409_v47 }
 0x1c0   :  { %v2121_v52 = vmax.f32 %v3486_v21, %v1929_v45 }
 0x1c1   :  { %v2120_v54 = vmax.f32 %v1409_v47, %v1928_v50  ;;  %v3489_v9 = vpop.f32.mrb[112].mxu0 }
 0x1c2   :  { %v1931_v56 = vmul.f32 0.01, %v3489_v9  ;;  %v1419_v57 = vpop.f32.mrb[113].mxu0 }
 0x1c3   :  { %v4826_v0 = vpack.c.bf16 %v2121_v52, %v2120_v54  ;;  %v1930_v2 = vmul.f32 0.01, %v1419_v57 }
 0x1c4   :  { %v2123_v5 = vmax.f32 %v3489_v9, %v1931_v56 }
 0x1c5   :  { %v2122_v59 = vmax.f32 %v1419_v57, %v1930_v2  ;;  %v3492_v6 = vpop.f32.mrb[114].mxu0 }
 0x1c6   :  { %v1933_v13 = vmul.f32 0.01, %v3492_v6  ;;  %v1429_v42 = vpop.f32.mrb[115].mxu0 }
 0x1c7   :  { %v3711_v44 = vpack.c.bf16 %v2123_v5, %v2122_v59  ;;  %v1932_v14 = vmul.f32 0.01, %v1429_v42 }
 0x1c8   :  { %v2125_v22 = vmax.f32 %v3492_v6, %v1933_v13 }
 0x1c9   :  { %v2124_v27 = vmax.f32 %v1429_v42, %v1932_v14  ;;  %v3495_v38 = vpop.f32.mrb[116].mxu0  ;;  %3712 = vmatprep.subr.bf16.mxu1 %v3711_v44 }
 0x1ca   :  { %v1935_v61 = vmul.f32 0.01, %v3495_v38  ;;  %v1439_v31 = vpop.f32.mrb[117].mxu0  ;;  %3714 = vmatpush3.bf16.msra.mxu1 %v4812_v17 }
 0x1cb   :  { %v3715_v37 = vpack.c.bf16 %v2125_v22, %v2124_v27  ;;  %v1934_v21 = vmul.f32 0.01, %v1439_v31 }
 0x1cc   :  { %v2127_v45 = vmax.f32 %v3495_v38, %v1935_v61 }
 0x1cd   :  { %v2126_v47 = vmax.f32 %v1439_v31, %v1934_v21  ;;  %v3498_v50 = vpop.f32.mrb[118].mxu0  ;;  %3716 = vmatprep.subr.bf16.mxu1 %v3715_v37 }
 0x1ce   :  { %v1937_v52 = vmul.f32 0.01, %v3498_v50  ;;  %v1449_v54 = vpop.f32.mrb[119].mxu0  ;;  %3718 = vmatpush3.bf16.msra.mxu1 %v4814_v35 }
 0x1cf   :  { %v3719_v9 = vpack.c.bf16 %v2127_v45, %v2126_v47  ;;  %v1936_v56 = vmul.f32 0.01, %v1449_v54 }
 0x1d0   :  { %v2129_v57 = vmax.f32 %v3498_v50, %v1937_v52 }
 0x1d1   :  { %v2128_v2 = vmax.f32 %v1449_v54, %v1936_v56  ;;  %v3501_v5 = vpop.f32.mrb[120].mxu0  ;;  %3720 = vmatprep.subr.bf16.mxu1 %v3719_v9 }
 0x1d2   :  { %v1939_v59 = vmul.f32 0.01, %v3501_v5  ;;  %v1459_v6 = vpop.f32.mrb[121].mxu0  ;;  %3722 = vmatpush3.bf16.msra.mxu1 %v4816_v49 }
 0x1d3   :  { %v3723_v17 = vpack.c.bf16 %v2129_v57, %v2128_v2  ;;  %v1938_v13 = vmul.f32 0.01, %v1459_v6 }
 0x1d4   :  { %v2131_v42 = vmax.f32 %v3501_v5, %v1939_v59 }
 0x1d5   :  { %v2130_v44 = vmax.f32 %v1459_v6, %v1938_v13  ;;  %v3504_v14 = vpop.f32.mrb[122].mxu0  ;;  %3724 = vmatprep.subr.bf16.mxu1 %v3723_v17  ;;  %v2234_v6 = vsub.s32 6, %v4467_v26 }
 0x1d6   :  { %v1941_v22 = vmul.f32 0.01, %v3504_v14  ;;  %v1469_v27 = vpop.f32.mrb[123].mxu0  ;;  %3726 = vmatpush3.bf16.msra.mxu1 %v4818_v20 }
 0x1d7   :  { %v3727_v35 = vpack.c.bf16 %v2131_v42, %v2130_v44  ;;  %v1940_v38 = vmul.f32 0.01, %v1469_v27  ;;  %v4839_v44 = vld [vmem:[%s4899_s2 + $0x8] sm:$0xf] }
 0x1d8   :  { %v2133_v61 = vmax.f32 %v3504_v14, %v1941_v22 }
 0x1d9   :  { %v2132_v31 = vmax.f32 %v1469_v27, %v1940_v38  ;;  %v3507_v37 = vpop.f32.mrb[124].mxu0  ;;  %3728 = vmatprep.subr.bf16.mxu1 %v3727_v35  ;;  %v2235_v27 = vrot.slane %v4807_v8, %v2234_v6 }
 0x1da   :  { %v1943_v21 = vmul.f32 0.01, %v3507_v37  ;;  %v1479_v45 = vpop.f32.mrb[125].mxu0  ;;  %3730 = vmatpush3.bf16.msra.mxu1 %v4820_v16 }
 0x1db   :  { %v3731_v49 = vpack.c.bf16 %v2133_v61, %v2132_v31  ;;  %v1942_v47 = vmul.f32 0.01, %v1479_v45 }
 0x1dc   :  { %v2135_v50 = vmax.f32 %v3507_v37, %v1943_v21 }
 0x1dd   :  { %v2134_v52 = vmax.f32 %v1479_v45, %v1942_v47  ;;  %v3510_v54 = vpop.f32.mrb[126].mxu0  ;;  %3732 = vmatprep.subr.bf16.mxu1 %v3731_v49 }
 0x1de   :  { %v1945_v9 = vmul.f32 0.01, %v3510_v54  ;;  %v1489_v56 = vpop.f32.mrb[127].mxu0  ;;  %3734 = vmatpush3.bf16.msra.mxu1 %v4822_v19 }
 0x1df   :  { %v3735_v20 = vpack.c.bf16 %v2135_v50, %v2134_v52  ;;  %v1944_v57 = vmul.f32 0.01, %v1489_v56 }
 0x1e0   :  { %v2137_v2 = vmax.f32 %v3510_v54, %v1945_v9 }
 0x1e1   :  { %v2136_v5 = vmax.f32 %v1489_v56, %v1944_v57  ;;  %v3513_v59 = vpop.f32.mrb[128].mxu0  ;;  %3736 = vmatprep.subr.bf16.mxu1 %v3735_v20 }
 0x1e2   :  { %v1947_v17 = vmul.f32 0.01, %v3513_v59  ;;  %v1499_v16 = vpop.f32.mrb[129].mxu0  ;;  %3738 = vmatpush3.bf16.msra.mxu1 %v4824_v46  ;;  %v2247_v46 = vrot.slane %v4839_v44, %v2214_v30 }
 0x1e3   :  { %v3739_v13 = vpack.c.bf16 %v2137_v2, %v2136_v5  ;;  %v1946_v42 = vmul.f32 0.01, %v1499_v16 }
 0x1e4   :  { %v2139_v19 = vmax.f32 %v3513_v59, %v1947_v17 }
 0x1e5   :  { %v2138_v14 = vmax.f32 %v1499_v16, %v1946_v42  ;;  %v3516_v22 = vpop.f32.mrb[130].mxu0  ;;  %3740 = vmatprep.subr.bf16.mxu1 %v3739_v13 }
 0x1e6   :  { %v1949_v35 = vmul.f32 0.01, %v3516_v22  ;;  %v1509_v38 = vpop.f32.mrb[131].mxu0  ;;  %3742 = vmatpush3.bf16.msra.mxu1 %v4826_v0 }
 0x1e7   :  { %v3745_v61 = vpack.c.bf16 %v2139_v19, %v2138_v14  ;;  %v1948_v31 = vmul.f32 0.01, %v1509_v38  ;;  %3744 = vmatprep.subr.bf16.mxu1 %v4717_v12 }
 0x1e8   :  { %v2141_v37 = vmax.f32 %v3516_v22, %v1949_v35 }
 0x1e9   :  { %v2140_v21 = vmax.f32 %v1509_v38, %v1948_v31  ;;  %v3519_v45 = vpop.f32.mrb[132].mxu0  ;;  %2543 = vmatmul.mubr.f32.vlgmr.msra.gmra.mrb[60].mxu1 %v2235_v27 }
 0x1ea   :  { %v1951_v49 = vmul.f32 0.01, %v3519_v45  ;;  %v1519_v47 = vpop.f32.mrb[133].mxu0  ;;  %3746 = vmatpush3.bf16.msra.mxu1 %v3745_v61  ;;  %2612 = vmatprep.mubr.f32.mxu1 %v2247_v46 }
 0x1eb   :  { %v3749_v8 = vpack.c.bf16 %v2141_v37, %v2140_v21  ;;  %v1950_v50 = vmul.f32 0.01, %v1519_v47  ;;  %3748 = vmatprep.subr.bf16.mxu1 %v4719_v1 }
 0x1ec   :  { %v2143_v0 = vmax.f32 %v3519_v45, %v1951_v49 }
 0x1ed   :  { %v2142_v52 = vmax.f32 %v1519_v47, %v1950_v50  ;;  %v3522_v54 = vpop.f32.mrb[134].mxu0 }
 0x1ee   :  { %v1953_v30 = vmul.f32 0.01, %v3522_v54  ;;  %v1529_v9 = vpop.f32.mrb[135].mxu0  ;;  %3750 = vmatpush3.bf16.msra.mxu1 %v3749_v8 }
 0x1ef   :  { %v3753_v56 = vpack.c.bf16 %v2143_v0, %v2142_v52  ;;  %v1952_v12 = vmul.f32 0.01, %v1529_v9  ;;  %3752 = vmatprep.subr.bf16.mxu1 %v4722_v51 }
 0x1f0   :  { %v2145_v20 = vmax.f32 %v3522_v54, %v1953_v30 }
 0x1f1   :  { %v2144_v57 = vmax.f32 %v1529_v9, %v1952_v12  ;;  %v3525_v2 = vpop.f32.mrb[136].mxu0 }
 0x1f2   :  { %v1955_v5 = vmul.f32 0.01, %v3525_v2  ;;  %v1539_v59 = vpop.f32.mrb[137].mxu0  ;;  %3754 = vmatpush3.bf16.msra.mxu1 %v3753_v56 }
 0x1f3   :  { %v3757_v6 = vpack.c.bf16 %v2145_v20, %v2144_v57  ;;  %v1954_v17 = vmul.f32 0.01, %v1539_v59  ;;  %3756 = vmatprep.subr.bf16.mxu1 %v4725_v3  ;;  %v2243_v3 = vrot.slane %v4839_v44, %v2210_v7  ;;  %v2251_v7 = vrot.slane %v4839_v44, %v2218_v53 }
 0x1f4   :  { %v2147_v1 = vmax.f32 %v3525_v2, %v1955_v5 }
 0x1f5   :  { %v2146_v16 = vmax.f32 %v1539_v59, %v1954_v17 }
 0x1f6   :  { %3758 = vmatpush3.bf16.msra.mxu1 %v3757_v6 }
 0x1f7   :  { %v3761_v13 = vpack.c.bf16 %v2147_v1, %v2146_v16  ;;  %3760 = vmatprep.subr.bf16.mxu1 %v4728_v55  ;;  %v2255_v55 = vrot.slane %v4839_v44, %v2222_v10  ;;  %v2205_v10 = vstv %s4900_s3  ;;  %s3843_s3 = smov [#allocation3]  }
 0x1f8   :  { %s2702_s10 = sshll.u32 %s3843_s3, 4  ;;  %s2703_s10 = int_to_ptr.vmem [resolvable:$true] %s2702_s10 }
 0x1f9   :  { %s3819_s11 = scalar_lea.vmem %s2703_s10, 16  ;;  %s3823_s12 = scalar_lea.vmem %s2703_s10, 32 }
 0x1fa   :  { %3762 = vmatpush3.bf16.msra.mxu1 %v3761_v13  ;;  %p3820_p0 = scmp.ne.s32.totalorder %s2703_s10, %s3819_s11  ;;  %p3824_p1 = scmp.lt.s32.totalorder %s2703_s10, %s2703_s10 }
 0x1fb   :  { %3764 = vmatprep.subr.bf16.mxu1 %v4731_v11  ;;  %p3825_p2 = scmp.lt.s32.totalorder %s3823_s12, %s3819_s11 }
 0x1fc   :  { %v3131_v51 = vpop.f32.mrb[54].mxu1 }
 0x1fd   :  { %v3132_v42 = vpop.f32.mrb[55].mxu1  ;;  %p3826_p3 = por %p3825_p2, %p3824_p1 }
 0x1fe   :  { %3766 = vmatpush3.bf16.msra.mxu1 %v4705_v62  ;;  %v3133_v19 = vadd.f32 %v3132_v42, %v3131_v51 }
 0x1ff   :  { %3768 = vmatprep.subr.bf16.mxu1 %v4734_v29  ;;  %p3827_p4 = pnand %p3826_p3, %p3820_p0 }
 0x200   :  { %v2335_v62 = vadd.f32 %v3133_v19, %v2205_v10 }
 0x202   :  { %3770 = vmatpush3.bf16.msra.mxu1 %v4709_v15 }
 0x203   :  { %3772 = vmatprep.subr.bf16.mxu1 %v4737_v48 }
 0x206   :  { %3774 = vmatpush3.bf16.msra.mxu1 %v4713_v32 }
 0x207   :  { %3776 = vmatprep.subr.bf16.mxu1 %v4779_v58 }
 0x209   :  { %2613 = vmatmul.mubr.f32.vlgmr.msra.gmra.mrb[62].mxu1 %v2243_v3 }
 0x20a   :  { %3778 = vmatpush3.bf16.msra.mxu1 %v4742_v33  ;;  %2682 = vmatprep.mubr.f32.mxu1 %v2255_v55 }
 0x20b   :  { %3780 = vmatprep.subr.bf16.mxu1 %v4781_v25 }
 0x20e   :  { %3782 = vmatpush3.bf16.msra.mxu1 %v4751_v24 }
 0x20f   :  { %3784 = vmatprep.subr.bf16.mxu1 %v4784_v39 }
 0x212   :  { %3786 = vmatpush3.bf16.msra.mxu1 %v4755_v41 }
 0x213   :  { %3788 = vmatprep.subr.bf16.mxu1 %v4787_v4 }
 0x216   :  { %3790 = vmatpush3.bf16.msra.mxu1 %v4759_v63 }
 0x217   :  { %3792 = vmatprep.subr.bf16.mxu1 %v4790_v34 }
 0x21a   :  { %3794 = vmatpush3.bf16.msra.mxu1 %v4763_v18 }
 0x21b   :  { %3796 = vmatprep.subr.bf16.mxu1 %v4793_v60 }
 0x21e   :  { %3798 = vmatpush3.bf16.msra.mxu1 %v4767_v40 }
 0x21f   :  { %3800 = vmatprep.subr.bf16.mxu1 %v4796_v28 }
 0x222   :  { %3802 = vmatpush3.bf16.msra.mxu1 %v4771_v36 }
 0x223   :  { %3804 = vmatprep.subr.bf16.mxu1 %v4799_v43 }
 0x226   :  { %3806 = vmatpush3.bf16.msra.mxu1 %v4775_v23 }
 0x229   :  { %2683 = vmatmul.mubr.f32.vlgmr.msra.gmra.mrb[64].mxu1 %v2251_v7 }
 0x23c   :  { %v3166_v15 = vpop.f32.mrb[56].mxu1 }
 0x23d   :  { %v3167_v32 = vpop.f32.mrb[57].mxu1 }
 0x23e   :  { %v3168_v11 = vadd.f32 %v3167_v32, %v3166_v15 }
 0x240   :  { %v2405_v29 = vadd.f32 %v3168_v11, %v2335_v62 }
 0x27c   :  { %v3201_v48 = vpop.f32.mrb[58].mxu1 }
 0x27d   :  { %v3202_v33 = vpop.f32.mrb[59].mxu1 }
 0x27e   :  { %v3203_v24 = vadd.f32 %v3202_v33, %v3201_v48 }
 0x280   :  { %v2475_v41 = vadd.f32 %v3203_v24, %v2405_v29 }
 0x2bc   :  { %v3236_v63 = vpop.f32.mrb[60].mxu1 }
 0x2bd   :  { %v3237_v26 = vpop.f32.mrb[61].mxu1 }
 0x2be   :  { %v3238_v18 = vadd.f32 %v3237_v26, %v3236_v63 }
 0x2c0   :  { %v2545_v53 = vadd.f32 %v3238_v18, %v2475_v41 }
 0x2dc   :  { %v3271_v40 = vpop.f32.mrb[62].mxu1 }
 0x2dd   :  { %v3272_v36 = vpop.f32.mrb[63].mxu1 }
 0x2de   :  { %v3273_v23 = vadd.f32 %v3272_v36, %v3271_v40 }
 0x2e0   :  { %v2615_v58 = vadd.f32 %v3273_v23, %v2545_v53 }
 0x2fc   :  { %v3306_v25 = vpop.f32.mrb[64].mxu1 }
 0x2fd   :  { %v3307_v39 = vpop.f32.mrb[65].mxu1 }
 0x2fe   :  { %v3308_v4 = vadd.f32 %v3307_v39, %v3306_v25 }
 0x300   :  { %v2685_v34 = vadd.f32 %v3308_v4, %v2615_v58 }
 0x302   :  { %v2688_v60 = vsub.f32 0.0, %v2685_v34 }
 0x304   :  { %v2689_v28 = vmul.f32 1.442695, %v2688_v60 }
 0x306   :  { %3814 = vpow2.f32 %v2689_v28 }
 0x310   :  { %v3815_v43 = vpop.eup %3814 }
 0x311   :  { %v2691_v44 = vadd.f32 1.0, %v3815_v43 }
 0x313   :  { %3816 = vrcp.f32 %v2691_v44 }
 0x31d   :  { %v3817_v14 = vpop.eup %3816 }
 0x31e   :  { %2695 = vst.msk [vmem:[#allocation3] sm:$0x1] %vm2694_vm1, %v3817_v14 }
 0x31f   :  { %3830 = shalt.err (!%p3827_p4)
}
 0x320   :  { %s3831_s15 = scalar_lea.hbm %s4901_s4, 16 }
 0x321   :  { %p3832_p5 = scmp.ne.s32.totalorder %s4901_s4, %s3831_s15  ;;  %p3835_p6 = scmp.lt.u32.totalorder %s3831_s15, %s4901_s4 }
 0x323   :  { %p3837_p7 = pnand %p3835_p6, %p3832_p5 }
 0x325   :  { %3840 = shalt.err (!%p3837_p7)
}
 0x326   :  { %2705 = dma.vmem_to_hbm [thread:$0]  %s2703_s10, 16, %s4901_s4, [#allocation4]  }
 0x327   :  { %3841 = dma.done.wait [#allocation4], 16  }
 0x328   :  { %3842 = vsyncadd [#allocation4], 4294967280 }
 0x329   :  { %2709 = vsyncpa [#allocation4], 1 }

</bundles_post_ra>
